<compile_context>
chip_gen: v7x
topology: tpu7x:2x2x1
jax: 0.10.0
libtpu: 0.0.40
codegen_flags: <defaults>
</compile_context>

<pallas_src>
import functools
import math

import jax
import jax.numpy as jnp
from jax.experimental import pallas as pl
from jax.experimental.pallas import tpu as pltpu


# ----------------------------------------------------------------------------
# Pallas kernel: full encoder stack (all layers) for one batch row per grid step
# ----------------------------------------------------------------------------
def _encoder_kernel(x_ref, padb_ref,
                    wq_ref, bq_ref, wk_ref, bk_ref, wv_ref, bv_ref,
                    wo_ref, bo_ref, g1_ref, be1_ref,
                    w1_ref, bf1_ref, w2_ref, bf2_ref,
                    g2_ref, be2_ref,
                    o_ref,
                    *, n_layers, n_heads, d_k, d_v):
    S = x_ref.shape[1]
    x = x_ref[0]               # (S, D) f32 activations for this batch row
    pad_bias = padb_ref[0]     # (1, S) f32 additive bias on key positions (0 / -1e9)

    # Attention mask built in-kernel: causal upper-triangle + pad-key bias.
    row = jax.lax.broadcasted_iota(jnp.int32, (S, S), 0)
    col = jax.lax.broadcasted_iota(jnp.int32, (S, S), 1)
    mask_bias = jnp.where(col > row, -1e9, 0.0).astype(jnp.float32) + pad_bias   # (S, S)

    scale = 1.0 / math.sqrt(d_k)

    def layer_norm(v, gamma, beta):
        mu = jnp.mean(v, axis=-1, keepdims=True)
        c = v - mu
        var = jnp.mean(c * c, axis=-1, keepdims=True)
        return c * jax.lax.rsqrt(var + 1e-5) * gamma + beta

    def split_heads(t, dh):
        # (rows, n_heads*dh) -> (n_heads, rows, dh) via static lane slices + stack.
        return jnp.stack([t[:, h * dh:(h + 1) * dh] for h in range(n_heads)], axis=0)

    for li in range(n_layers):
        last = li == (n_layers - 1)
        xb = x.astype(jnp.bfloat16)
        # Only the final position is consumed downstream; the last layer restricts
        # the query side / FFN / LayerNorms to row S-1 (K/V still use the full seq).
        xq_b = xb[S - 1:S, :] if last else xb
        x_res = x[S - 1:S, :] if last else x
        mb = mask_bias[S - 1:S, :] if last else mask_bias

        # ---- multi-head self attention (bf16 MXU, f32 accumulate) ----
        q = jnp.dot(xq_b, wq_ref[li], preferred_element_type=jnp.float32) + bq_ref[li]
        k = jnp.dot(xb, wk_ref[li], preferred_element_type=jnp.float32) + bk_ref[li]
        v = jnp.dot(xb, wv_ref[li], preferred_element_type=jnp.float32) + bv_ref[li]

        qh = split_heads(q.astype(jnp.bfloat16), d_k)   # (H, Sq, d_k)
        kh = split_heads(k.astype(jnp.bfloat16), d_k)   # (H, S,  d_k)
        vh = split_heads(v.astype(jnp.bfloat16), d_v)   # (H, S,  d_v)

        s = jnp.einsum('hqd,hkd->hqk', qh, kh,
                       preferred_element_type=jnp.float32) * scale      # (H, Sq, S)
        s = s + mb[None, :, :]
        s = s - jnp.max(s, axis=-1, keepdims=True)
        p = jnp.exp(s)
        attn = p * pl.reciprocal(jnp.sum(p, axis=-1, keepdims=True), approx=True)
        ctx = jnp.einsum('hqk,hkd->hqd', attn.astype(jnp.bfloat16), vh,
                         preferred_element_type=jnp.float32)            # (H, Sq, d_v)
        ctx = jnp.concatenate([ctx[h] for h in range(n_heads)], axis=-1)  # (Sq, H*d_v)

        attn_out = jnp.dot(ctx.astype(jnp.bfloat16), wo_ref[li],
                           preferred_element_type=jnp.float32) + bo_ref[li]
        h1 = layer_norm(x_res + attn_out, g1_ref[li], be1_ref[li])

        # ---- position-wise feed forward ----
        f = jnp.dot(h1.astype(jnp.bfloat16), w1_ref[li],
                    preferred_element_type=jnp.float32) + bf1_ref[li]
        f = jnp.maximum(f, 0.0)
        f = jnp.dot(f.astype(jnp.bfloat16), w2_ref[li],
                    preferred_element_type=jnp.float32) + bf2_ref[li]
        x = layer_norm(h1 + f, g2_ref[li], be2_ref[li])   # (S, D) or (1, D) on last layer

    o_ref[0] = x   # (1, D): last-position output of the final layer


# ----------------------------------------------------------------------------
# pallas_call wrapper
# ----------------------------------------------------------------------------
def encoder_pallas(x, pad_bias, params, *, n_heads, d_k, d_v):
    """x: (B,S,D) f32, pad_bias: (B,1,S) f32, params: dict of layer-stacked weights."""
    B, S, D = x.shape
    n_layers = params["wq"].shape[0]

    kernel = functools.partial(_encoder_kernel, n_layers=n_layers,
                               n_heads=n_heads, d_k=d_k, d_v=d_v)

    # Matmul operands fed to the MXU in bf16; biases / LayerNorm params stay f32.
    wq = params["wq"].astype(jnp.bfloat16)
    wk = params["wk"].astype(jnp.bfloat16)
    wv = params["wv"].astype(jnp.bfloat16)
    wo = params["wo"].astype(jnp.bfloat16)
    w1 = params["w1"].astype(jnp.bfloat16)
    w2 = params["w2"].astype(jnp.bfloat16)

    args = (x, pad_bias,
            wq, params["bq"], wk, params["bk"], wv, params["bv"],
            wo, params["bo"], params["g1"], params["be1"],
            w1, params["bf1"], w2, params["bf2"],
            params["g2"], params["be2"])

    def full_spec(a):
        nd = a.ndim
        return pl.BlockSpec(a.shape, lambda b, _nd=nd: (0,) * _nd)

    in_specs = ([pl.BlockSpec((1, S, D), lambda b: (b, 0, 0)),     # activations
                 pl.BlockSpec((1, 1, S), lambda b: (b, 0, 0))]     # pad bias
                + [full_spec(a) for a in args[2:]])                # stacked weights

    out = pl.pallas_call(
        kernel,
        out_shape=jax.ShapeDtypeStruct((B, 1, D), jnp.float32),
        grid_spec=pltpu.PrefetchScalarGridSpec(
            num_scalar_prefetch=0,
            grid=(B,),
            in_specs=in_specs,
            out_specs=pl.BlockSpec((1, 1, D), lambda b: (b, 0, 0)),
        ),
        compiler_params=pltpu.CompilerParams(dimension_semantics=("parallel",)),
    )(*args)
    return out[:, 0, :]


# ----------------------------------------------------------------------------
# Encoder forward (embedding / pad-flag glue in plain JAX, all layers in Pallas)
# ----------------------------------------------------------------------------
def encoder_forward(tokens, params, *, mask_item, n_heads, d_k, d_v):
    B, S = tokens.shape
    D = params["seq_embed"].shape[1]

    # Embedding (padding_idx row is zero) + sqrt(d) scale + learnable pos enc.
    emb = jnp.take(params["seq_embed"], tokens, axis=0)                  # (B, S, D)
    x = (emb * (D ** 0.5) + params["pos_embed"][:S][None, :, :]).astype(jnp.float32)

    # Pad-key additive bias (B,1,S); causal part is rebuilt inside the kernel.
    pad = jnp.zeros((B, S), dtype=bool)
    for m in mask_item:
        pad = pad | (tokens == m)
    pad_bias = jnp.where(pad, -1e9, 0.0).astype(jnp.float32)[:, None, :]

    return encoder_pallas(x, pad_bias, params, n_heads=n_heads, d_k=d_k, d_v=d_v)


# ----------------------------------------------------------------------------
# Deterministic parameter init (synthetic; shapes follow the PyTorch module,
# weights stored (in_features, out_features) and stacked across layers)
# ----------------------------------------------------------------------------
def init_params(key, *, d, d_fc, n_heads, n_layers, input_types,
                posenc_buffer_size, mask_item, d_k, d_v):
    def nrm(k, shape, scale=0.02):
        return (scale * jax.random.normal(k, shape)).astype(jnp.float32)

    ks = jax.random.split(key, 8)
    seq_embed = nrm(ks[0], (input_types, d)).at[mask_item[0]].set(0.0)   # padding_idx row
    pos_embed = nrm(ks[1], (posenc_buffer_size, d))

    L = n_layers
    return dict(
        seq_embed=seq_embed, pos_embed=pos_embed,
        wq=nrm(ks[2], (L, d, n_heads * d_k)), bq=jnp.zeros((L, 1, n_heads * d_k), jnp.float32),
        wk=nrm(ks[3], (L, d, n_heads * d_k)), bk=jnp.zeros((L, 1, n_heads * d_k), jnp.float32),
        wv=nrm(ks[4], (L, d, n_heads * d_v)), bv=jnp.zeros((L, 1, n_heads * d_v), jnp.float32),
        wo=nrm(ks[5], (L, n_heads * d_v, d)), bo=jnp.zeros((L, 1, d), jnp.float32),
        g1=jnp.ones((L, 1, d), jnp.float32), be1=jnp.zeros((L, 1, d), jnp.float32),
        w1=nrm(ks[6], (L, d, d_fc)), bf1=jnp.zeros((L, 1, d_fc), jnp.float32),
        w2=nrm(ks[7], (L, d_fc, d)), bf2=jnp.zeros((L, 1, d), jnp.float32),
        g2=jnp.ones((L, 1, d), jnp.float32), be2=jnp.zeros((L, 1, d), jnp.float32),
    )


if __name__ == "__main__":
    # Small, module-consistent config.
    B, S = 2, 8
    d, d_fc, n_heads, n_layers = 32, 64, 2, 2
    d_k = d_v = d // n_heads
    input_types = 50
    posenc_buffer_size = 64
    mask_item = [0]

    key = jax.random.PRNGKey(0)
    pkey, tkey = jax.random.split(key)
    params = init_params(pkey, d=d, d_fc=d_fc, n_heads=n_heads, n_layers=n_layers,
                         input_types=input_types, posenc_buffer_size=posenc_buffer_size,
                         mask_item=mask_item, d_k=d_k, d_v=d_v)

    # Token ids in [1, input_types); sprinkle some padding (0) tokens at the front.
    tokens = jax.random.randint(tkey, (B, S), 1, input_types, dtype=jnp.int32)
    tokens = tokens.at[:, 0].set(0)

    out = encoder_forward(tokens, params, mask_item=mask_item,
                          n_heads=n_heads, d_k=d_k, d_v=d_v)
    out = jax.block_until_ready(out)
    assert out.shape == (B, d), out.shape
    print("KERNEL_OK")
</pallas_src>

<mosaic_0001>
module attributes {stable_mosaic.version = 11 : i64} {
  func.func @_encoder_kernel(%arg0: i32, %arg1: memref<1x8x32xf32, #tpu.memory_space<vmem>>, %arg2: memref<1x1x8xf32, #tpu.memory_space<vmem>>, %arg3: memref<2x32x32xbf16, #tpu.memory_space<vmem>>, %arg4: memref<2x1x32xf32, #tpu.memory_space<vmem>>, %arg5: memref<2x32x32xbf16, #tpu.memory_space<vmem>>, %arg6: memref<2x1x32xf32, #tpu.memory_space<vmem>>, %arg7: memref<2x32x32xbf16, #tpu.memory_space<vmem>>, %arg8: memref<2x1x32xf32, #tpu.memory_space<vmem>>, %arg9: memref<2x32x32xbf16, #tpu.memory_space<vmem>>, %arg10: memref<2x1x32xf32, #tpu.memory_space<vmem>>, %arg11: memref<2x1x32xf32, #tpu.memory_space<vmem>>, %arg12: memref<2x1x32xf32, #tpu.memory_space<vmem>>, %arg13: memref<2x32x64xbf16, #tpu.memory_space<vmem>>, %arg14: memref<2x1x64xf32, #tpu.memory_space<vmem>>, %arg15: memref<2x64x32xbf16, #tpu.memory_space<vmem>>, %arg16: memref<2x1x32xf32, #tpu.memory_space<vmem>>, %arg17: memref<2x1x32xf32, #tpu.memory_space<vmem>>, %arg18: memref<2x1x32xf32, #tpu.memory_space<vmem>>, %arg19: memref<1x1x32xf32, #tpu.memory_space<vmem>>) attributes {dimension_semantics = [#tpu.dimension_semantics<parallel>], iteration_bounds = array<i64: 2>, scalar_prefetch = 0 : i64, scratch_operands = 0 : i64, tpu.core_type = #tpu.core_type<tc>, window_params = [{transform_indices = @transform_0, window_bounds = array<i64: 1, 8, 32>}, {transform_indices = @transform_1, window_bounds = array<i64: 1, 1, 8>}, {pipeline_mode = #tpu.pipeline_mode<synchronous>, transform_indices = @transform_2, window_bounds = array<i64: 2, 32, 32>}, {pipeline_mode = #tpu.pipeline_mode<synchronous>, transform_indices = @transform_3, window_bounds = array<i64: 2, 1, 32>}, {pipeline_mode = #tpu.pipeline_mode<synchronous>, transform_indices = @transform_4, window_bounds = array<i64: 2, 32, 32>}, {pipeline_mode = #tpu.pipeline_mode<synchronous>, transform_indices = @transform_5, window_bounds = array<i64: 2, 1, 32>}, {pipeline_mode = #tpu.pipeline_mode<synchronous>, transform_indices = @transform_6, window_bounds = array<i64: 2, 32, 32>}, {pipeline_mode = #tpu.pipeline_mode<synchronous>, transform_indices = @transform_7, window_bounds = array<i64: 2, 1, 32>}, {pipeline_mode = #tpu.pipeline_mode<synchronous>, transform_indices = @transform_8, window_bounds = array<i64: 2, 32, 32>}, {pipeline_mode = #tpu.pipeline_mode<synchronous>, transform_indices = @transform_9, window_bounds = array<i64: 2, 1, 32>}, {pipeline_mode = #tpu.pipeline_mode<synchronous>, transform_indices = @transform_10, window_bounds = array<i64: 2, 1, 32>}, {pipeline_mode = #tpu.pipeline_mode<synchronous>, transform_indices = @transform_11, window_bounds = array<i64: 2, 1, 32>}, {pipeline_mode = #tpu.pipeline_mode<synchronous>, transform_indices = @transform_12, window_bounds = array<i64: 2, 32, 64>}, {pipeline_mode = #tpu.pipeline_mode<synchronous>, transform_indices = @transform_13, window_bounds = array<i64: 2, 1, 64>}, {pipeline_mode = #tpu.pipeline_mode<synchronous>, transform_indices = @transform_14, window_bounds = array<i64: 2, 64, 32>}, {pipeline_mode = #tpu.pipeline_mode<synchronous>, transform_indices = @transform_15, window_bounds = array<i64: 2, 1, 32>}, {pipeline_mode = #tpu.pipeline_mode<synchronous>, transform_indices = @transform_16, window_bounds = array<i64: 2, 1, 32>}, {pipeline_mode = #tpu.pipeline_mode<synchronous>, transform_indices = @transform_17, window_bounds = array<i64: 2, 1, 32>}, {transform_indices = @transform_18, window_bounds = array<i64: 1, 1, 32>}]} {
    %c0 = arith.constant 0 : index
    %c0_0 = arith.constant 0 : index
    %c0_1 = arith.constant 0 : index
    %0 = vector.load %arg1[%c0, %c0_0, %c0_1] : memref<1x8x32xf32, #tpu.memory_space<vmem>>, vector<1x8x32xf32>
    %1 = vector.shape_cast %0 : vector<1x8x32xf32> to vector<8x32xf32>
    %c0_2 = arith.constant 0 : index
    %c0_3 = arith.constant 0 : index
    %c0_4 = arith.constant 0 : index
    %2 = vector.load %arg2[%c0_2, %c0_3, %c0_4] : memref<1x1x8xf32, #tpu.memory_space<vmem>>, vector<1x1x8xf32>
    %3 = vector.shape_cast %2 : vector<1x1x8xf32> to vector<1x8xf32>
    %4 = tpu.iota {dimensions = array<i32: 0>} : vector<8x8xi32>
    %5 = tpu.iota {dimensions = array<i32: 1>} : vector<8x8xi32>
    %6 = arith.cmpi sgt, %5, %4 : vector<8x8xi32>
    %cst = arith.constant -1.000000e+09 : f32
    %cst_5 = arith.constant 0.000000e+00 : f32
    %7 = vector.broadcast %cst : f32 to vector<8x8xf32>
    %8 = vector.broadcast %cst_5 : f32 to vector<8x8xf32>
    %9 = arith.select %6, %7, %8 : vector<8x8xi1>, vector<8x8xf32>
    %10 = vector.broadcast %3 : vector<1x8xf32> to vector<8x8xf32>
    %11 = arith.addf %9, %10 : vector<8x8xf32>
    %12 = arith.truncf %1 : vector<8x32xf32> to vector<8x32xbf16>
    %c0_6 = arith.constant 0 : index
    %c0_7 = arith.constant 0 : index
    %c0_8 = arith.constant 0 : index
    %13 = vector.load %arg3[%c0_6, %c0_7, %c0_8] : memref<2x32x32xbf16, #tpu.memory_space<vmem>>, vector<1x32x32xbf16>
    %14 = vector.shape_cast %13 : vector<1x32x32xbf16> to vector<32x32xbf16>
    %cst_9 = arith.constant dense<0.000000e+00> : vector<8x32xf32>
    %15 = tpu.matmul %12, %14, %cst_9 {dimension_numbers = #tpu.dot_dimension_numbers<[1], [0], [0], [1], [0, 0, 1, 1], [], []>} : vector<8x32xbf16>, vector<32x32xbf16>, vector<8x32xf32> -> vector<8x32xf32>
    %c0_10 = arith.constant 0 : index
    %c0_11 = arith.constant 0 : index
    %c0_12 = arith.constant 0 : index
    %16 = vector.load %arg4[%c0_10, %c0_11, %c0_12] : memref<2x1x32xf32, #tpu.memory_space<vmem>>, vector<1x1x32xf32>
    %17 = vector.shape_cast %16 : vector<1x1x32xf32> to vector<1x32xf32>
    %18 = vector.broadcast %17 : vector<1x32xf32> to vector<8x32xf32>
    %19 = arith.addf %15, %18 : vector<8x32xf32>
    %c0_13 = arith.constant 0 : index
    %c0_14 = arith.constant 0 : index
    %c0_15 = arith.constant 0 : index
    %20 = vector.load %arg5[%c0_13, %c0_14, %c0_15] : memref<2x32x32xbf16, #tpu.memory_space<vmem>>, vector<1x32x32xbf16>
    %21 = vector.shape_cast %20 : vector<1x32x32xbf16> to vector<32x32xbf16>
    %cst_16 = arith.constant dense<0.000000e+00> : vector<8x32xf32>
    %22 = tpu.matmul %12, %21, %cst_16 {dimension_numbers = #tpu.dot_dimension_numbers<[1], [0], [0], [1], [0, 0, 1, 1], [], []>} : vector<8x32xbf16>, vector<32x32xbf16>, vector<8x32xf32> -> vector<8x32xf32>
    %c0_17 = arith.constant 0 : index
    %c0_18 = arith.constant 0 : index
    %c0_19 = arith.constant 0 : index
    %23 = vector.load %arg6[%c0_17, %c0_18, %c0_19] : memref<2x1x32xf32, #tpu.memory_space<vmem>>, vector<1x1x32xf32>
    %24 = vector.shape_cast %23 : vector<1x1x32xf32> to vector<1x32xf32>
    %25 = vector.broadcast %24 : vector<1x32xf32> to vector<8x32xf32>
    %26 = arith.addf %22, %25 : vector<8x32xf32>
    %c0_20 = arith.constant 0 : index
    %c0_21 = arith.constant 0 : index
    %c0_22 = arith.constant 0 : index
    %27 = vector.load %arg7[%c0_20, %c0_21, %c0_22] : memref<2x32x32xbf16, #tpu.memory_space<vmem>>, vector<1x32x32xbf16>
    %28 = vector.shape_cast %27 : vector<1x32x32xbf16> to vector<32x32xbf16>
    %cst_23 = arith.constant dense<0.000000e+00> : vector<8x32xf32>
    %29 = tpu.matmul %12, %28, %cst_23 {dimension_numbers = #tpu.dot_dimension_numbers<[1], [0], [0], [1], [0, 0, 1, 1], [], []>} : vector<8x32xbf16>, vector<32x32xbf16>, vector<8x32xf32> -> vector<8x32xf32>
    %c0_24 = arith.constant 0 : index
    %c0_25 = arith.constant 0 : index
    %c0_26 = arith.constant 0 : index
    %30 = vector.load %arg8[%c0_24, %c0_25, %c0_26] : memref<2x1x32xf32, #tpu.memory_space<vmem>>, vector<1x1x32xf32>
    %31 = vector.shape_cast %30 : vector<1x1x32xf32> to vector<1x32xf32>
    %32 = vector.broadcast %31 : vector<1x32xf32> to vector<8x32xf32>
    %33 = arith.addf %29, %32 : vector<8x32xf32>
    %34 = arith.truncf %19 : vector<8x32xf32> to vector<8x32xbf16>
    %35 = vector.extract_strided_slice %34 {offsets = [0, 0], sizes = [8, 16], strides = [1, 1]} : vector<8x32xbf16> to vector<8x16xbf16>
    %36 = vector.extract_strided_slice %34 {offsets = [0, 16], sizes = [8, 16], strides = [1, 1]} : vector<8x32xbf16> to vector<8x16xbf16>
    %37 = vector.shape_cast %35 : vector<8x16xbf16> to vector<1x8x16xbf16>
    %38 = vector.shape_cast %36 : vector<8x16xbf16> to vector<1x8x16xbf16>
    %39 = tpu.concatenate %37, %38 in 0 : vector<1x8x16xbf16>, vector<1x8x16xbf16> -> vector<2x8x16xbf16>
    %40 = arith.truncf %26 : vector<8x32xf32> to vector<8x32xbf16>
    %41 = vector.extract_strided_slice %40 {offsets = [0, 0], sizes = [8, 16], strides = [1, 1]} : vector<8x32xbf16> to vector<8x16xbf16>
    %42 = vector.extract_strided_slice %40 {offsets = [0, 16], sizes = [8, 16], strides = [1, 1]} : vector<8x32xbf16> to vector<8x16xbf16>
    %43 = vector.shape_cast %41 : vector<8x16xbf16> to vector<1x8x16xbf16>
    %44 = vector.shape_cast %42 : vector<8x16xbf16> to vector<1x8x16xbf16>
    %45 = tpu.concatenate %43, %44 in 0 : vector<1x8x16xbf16>, vector<1x8x16xbf16> -> vector<2x8x16xbf16>
    %46 = arith.truncf %33 : vector<8x32xf32> to vector<8x32xbf16>
    %47 = vector.extract_strided_slice %46 {offsets = [0, 0], sizes = [8, 16], strides = [1, 1]} : vector<8x32xbf16> to vector<8x16xbf16>
    %48 = vector.extract_strided_slice %46 {offsets = [0, 16], sizes = [8, 16], strides = [1, 1]} : vector<8x32xbf16> to vector<8x16xbf16>
    %49 = vector.shape_cast %47 : vector<8x16xbf16> to vector<1x8x16xbf16>
    %50 = vector.shape_cast %48 : vector<8x16xbf16> to vector<1x8x16xbf16>
    %51 = tpu.concatenate %49, %50 in 0 : vector<1x8x16xbf16>, vector<1x8x16xbf16> -> vector<2x8x16xbf16>
    "tpu.trace_start"() <{level = 10 : i32, message = "hqd,hkd->hqk"}> : () -> ()
    %cst_27 = arith.constant dense<0.000000e+00> : vector<2x8x8xf32>
    %52 = tpu.matmul %39, %45, %cst_27 {dimension_numbers = #tpu.dot_dimension_numbers<[2], [2], [1], [1], [0, 0, 0, 1, 1, 1], [0], [0]>} : vector<2x8x16xbf16>, vector<2x8x16xbf16>, vector<2x8x8xf32> -> vector<2x8x8xf32>
    "tpu.trace_stop"() : () -> ()
    %cst_28 = arith.constant 2.500000e-01 : f32
    %53 = vector.broadcast %cst_28 : f32 to vector<2x8x8xf32>
    %54 = arith.mulf %52, %53 : vector<2x8x8xf32>
    %55 = vector.shape_cast %11 : vector<8x8xf32> to vector<1x8x8xf32>
    %56 = vector.broadcast %55 : vector<1x8x8xf32> to vector<2x8x8xf32>
    %57 = arith.addf %54, %56 : vector<2x8x8xf32>
    %cst_29 = arith.constant dense<0xFF800000> : vector<2x8xf32>
    %58 = vector.multi_reduction <maximumf>, %57, %cst_29 [2] : vector<2x8x8xf32> to vector<2x8xf32>
    %59 = vector.shape_cast %58 : vector<2x8xf32> to vector<2x8x1xf32>
    %60 = vector.broadcast %59 : vector<2x8x1xf32> to vector<2x8x8xf32>
    %61 = arith.subf %57, %60 : vector<2x8x8xf32>
    %62 = math.exp %61 : vector<2x8x8xf32>
    %cst_30 = arith.constant dense<0.000000e+00> : vector<2x8xf32>
    %63 = vector.multi_reduction <add>, %62, %cst_30 [2] : vector<2x8x8xf32> to vector<2x8xf32>
    %64 = vector.shape_cast %63 : vector<2x8xf32> to vector<2x8x1xf32>
    %65 = tpu.reciprocal %64 {approx = true} : vector<2x8x1xf32> -> vector<2x8x1xf32>
    %66 = vector.broadcast %65 : vector<2x8x1xf32> to vector<2x8x8xf32>
    %67 = arith.mulf %62, %66 : vector<2x8x8xf32>
    %68 = arith.truncf %67 : vector<2x8x8xf32> to vector<2x8x8xbf16>
    "tpu.trace_start"() <{level = 10 : i32, message = "hqk,hkd->hqd"}> : () -> ()
    %cst_31 = arith.constant dense<0.000000e+00> : vector<2x8x16xf32>
    %69 = tpu.matmul %68, %51, %cst_31 {dimension_numbers = #tpu.dot_dimension_numbers<[2], [1], [1], [2], [0, 0, 0, 1, 1, 2], [0], [0]>} : vector<2x8x8xbf16>, vector<2x8x16xbf16>, vector<2x8x16xf32> -> vector<2x8x16xf32>
    "tpu.trace_stop"() : () -> ()
    %70 = vector.extract_strided_slice %69 {offsets = [0, 0, 0], sizes = [1, 8, 16], strides = [1, 1, 1]} : vector<2x8x16xf32> to vector<1x8x16xf32>
    %71 = vector.shape_cast %70 : vector<1x8x16xf32> to vector<8x16xf32>
    %72 = vector.extract_strided_slice %69 {offsets = [1, 0, 0], sizes = [1, 8, 16], strides = [1, 1, 1]} : vector<2x8x16xf32> to vector<1x8x16xf32>
    %73 = vector.shape_cast %72 : vector<1x8x16xf32> to vector<8x16xf32>
    %74 = tpu.concatenate %71, %73 in 1 : vector<8x16xf32>, vector<8x16xf32> -> vector<8x32xf32>
    %75 = arith.truncf %74 : vector<8x32xf32> to vector<8x32xbf16>
    %c0_32 = arith.constant 0 : index
    %c0_33 = arith.constant 0 : index
    %c0_34 = arith.constant 0 : index
    %76 = vector.load %arg9[%c0_32, %c0_33, %c0_34] : memref<2x32x32xbf16, #tpu.memory_space<vmem>>, vector<1x32x32xbf16>
    %77 = vector.shape_cast %76 : vector<1x32x32xbf16> to vector<32x32xbf16>
    %cst_35 = arith.constant dense<0.000000e+00> : vector<8x32xf32>
    %78 = tpu.matmul %75, %77, %cst_35 {dimension_numbers = #tpu.dot_dimension_numbers<[1], [0], [0], [1], [0, 0, 1, 1], [], []>} : vector<8x32xbf16>, vector<32x32xbf16>, vector<8x32xf32> -> vector<8x32xf32>
    %c0_36 = arith.constant 0 : index
    %c0_37 = arith.constant 0 : index
    %c0_38 = arith.constant 0 : index
    %79 = vector.load %arg10[%c0_36, %c0_37, %c0_38] : memref<2x1x32xf32, #tpu.memory_space<vmem>>, vector<1x1x32xf32>
    %80 = vector.shape_cast %79 : vector<1x1x32xf32> to vector<1x32xf32>
    %81 = vector.broadcast %80 : vector<1x32xf32> to vector<8x32xf32>
    %82 = arith.addf %78, %81 : vector<8x32xf32>
    %83 = arith.addf %1, %82 : vector<8x32xf32>
    %c0_39 = arith.constant 0 : index
    %c0_40 = arith.constant 0 : index
    %c0_41 = arith.constant 0 : index
    %84 = vector.load %arg11[%c0_39, %c0_40, %c0_41] : memref<2x1x32xf32, #tpu.memory_space<vmem>>, vector<1x1x32xf32>
    %85 = vector.shape_cast %84 : vector<1x1x32xf32> to vector<1x32xf32>
    %c0_42 = arith.constant 0 : index
    %c0_43 = arith.constant 0 : index
    %c0_44 = arith.constant 0 : index
    %86 = vector.load %arg12[%c0_42, %c0_43, %c0_44] : memref<2x1x32xf32, #tpu.memory_space<vmem>>, vector<1x1x32xf32>
    %87 = vector.shape_cast %86 : vector<1x1x32xf32> to vector<1x32xf32>
    %cst_45 = arith.constant dense<0.000000e+00> : vector<8xf32>
    %88 = vector.multi_reduction <add>, %83, %cst_45 [1] : vector<8x32xf32> to vector<8xf32>
    %89 = vector.shape_cast %88 : vector<8xf32> to vector<8x1xf32>
    %cst_46 = arith.constant 3.200000e+01 : f32
    %90 = vector.broadcast %cst_46 : f32 to vector<8x1xf32>
    %91 = arith.divf %89, %90 : vector<8x1xf32>
    %92 = vector.broadcast %91 : vector<8x1xf32> to vector<8x32xf32>
    %93 = arith.subf %83, %92 : vector<8x32xf32>
    %94 = arith.mulf %93, %93 : vector<8x32xf32>
    %cst_47 = arith.constant dense<0.000000e+00> : vector<8xf32>
    %95 = vector.multi_reduction <add>, %94, %cst_47 [1] : vector<8x32xf32> to vector<8xf32>
    %96 = vector.shape_cast %95 : vector<8xf32> to vector<8x1xf32>
    %cst_48 = arith.constant 3.200000e+01 : f32
    %97 = vector.broadcast %cst_48 : f32 to vector<8x1xf32>
    %98 = arith.divf %96, %97 : vector<8x1xf32>
    %cst_49 = arith.constant 9.99999974E-6 : f32
    %99 = vector.broadcast %cst_49 : f32 to vector<8x1xf32>
    %100 = arith.addf %98, %99 : vector<8x1xf32>
    %101 = math.rsqrt %100 : vector<8x1xf32>
    %102 = vector.broadcast %101 : vector<8x1xf32> to vector<8x32xf32>
    %103 = arith.mulf %93, %102 : vector<8x32xf32>
    %104 = vector.broadcast %85 : vector<1x32xf32> to vector<8x32xf32>
    %105 = arith.mulf %103, %104 : vector<8x32xf32>
    %106 = vector.broadcast %87 : vector<1x32xf32> to vector<8x32xf32>
    %107 = arith.addf %105, %106 : vector<8x32xf32>
    %108 = arith.truncf %107 : vector<8x32xf32> to vector<8x32xbf16>
    %c0_50 = arith.constant 0 : index
    %c0_51 = arith.constant 0 : index
    %c0_52 = arith.constant 0 : index
    %109 = vector.load %arg13[%c0_50, %c0_51, %c0_52] : memref<2x32x64xbf16, #tpu.memory_space<vmem>>, vector<1x32x64xbf16>
    %110 = vector.shape_cast %109 : vector<1x32x64xbf16> to vector<32x64xbf16>
    %cst_53 = arith.constant dense<0.000000e+00> : vector<8x64xf32>
    %111 = tpu.matmul %108, %110, %cst_53 {dimension_numbers = #tpu.dot_dimension_numbers<[1], [0], [0], [1], [0, 0, 1, 1], [], []>} : vector<8x32xbf16>, vector<32x64xbf16>, vector<8x64xf32> -> vector<8x64xf32>
    %c0_54 = arith.constant 0 : index
    %c0_55 = arith.constant 0 : index
    %c0_56 = arith.constant 0 : index
    %112 = vector.load %arg14[%c0_54, %c0_55, %c0_56] : memref<2x1x64xf32, #tpu.memory_space<vmem>>, vector<1x1x64xf32>
    %113 = vector.shape_cast %112 : vector<1x1x64xf32> to vector<1x64xf32>
    %114 = vector.broadcast %113 : vector<1x64xf32> to vector<8x64xf32>
    %115 = arith.addf %111, %114 : vector<8x64xf32>
    %cst_57 = arith.constant 0.000000e+00 : f32
    %116 = vector.broadcast %cst_57 : f32 to vector<8x64xf32>
    %117 = arith.maximumf %115, %116 : vector<8x64xf32>
    %118 = arith.truncf %117 : vector<8x64xf32> to vector<8x64xbf16>
    %c0_58 = arith.constant 0 : index
    %c0_59 = arith.constant 0 : index
    %c0_60 = arith.constant 0 : index
    %119 = vector.load %arg15[%c0_58, %c0_59, %c0_60] : memref<2x64x32xbf16, #tpu.memory_space<vmem>>, vector<1x64x32xbf16>
    %120 = vector.shape_cast %119 : vector<1x64x32xbf16> to vector<64x32xbf16>
    %cst_61 = arith.constant dense<0.000000e+00> : vector<8x32xf32>
    %121 = tpu.matmul %118, %120, %cst_61 {dimension_numbers = #tpu.dot_dimension_numbers<[1], [0], [0], [1], [0, 0, 1, 1], [], []>} : vector<8x64xbf16>, vector<64x32xbf16>, vector<8x32xf32> -> vector<8x32xf32>
    %c0_62 = arith.constant 0 : index
    %c0_63 = arith.constant 0 : index
    %c0_64 = arith.constant 0 : index
    %122 = vector.load %arg16[%c0_62, %c0_63, %c0_64] : memref<2x1x32xf32, #tpu.memory_space<vmem>>, vector<1x1x32xf32>
    %123 = vector.shape_cast %122 : vector<1x1x32xf32> to vector<1x32xf32>
    %124 = vector.broadcast %123 : vector<1x32xf32> to vector<8x32xf32>
    %125 = arith.addf %121, %124 : vector<8x32xf32>
    %126 = arith.addf %107, %125 : vector<8x32xf32>
    %c0_65 = arith.constant 0 : index
    %c0_66 = arith.constant 0 : index
    %c0_67 = arith.constant 0 : index
    %127 = vector.load %arg17[%c0_65, %c0_66, %c0_67] : memref<2x1x32xf32, #tpu.memory_space<vmem>>, vector<1x1x32xf32>
    %128 = vector.shape_cast %127 : vector<1x1x32xf32> to vector<1x32xf32>
    %c0_68 = arith.constant 0 : index
    %c0_69 = arith.constant 0 : index
    %c0_70 = arith.constant 0 : index
    %129 = vector.load %arg18[%c0_68, %c0_69, %c0_70] : memref<2x1x32xf32, #tpu.memory_space<vmem>>, vector<1x1x32xf32>
    %130 = vector.shape_cast %129 : vector<1x1x32xf32> to vector<1x32xf32>
    %cst_71 = arith.constant dense<0.000000e+00> : vector<8xf32>
    %131 = vector.multi_reduction <add>, %126, %cst_71 [1] : vector<8x32xf32> to vector<8xf32>
    %132 = vector.shape_cast %131 : vector<8xf32> to vector<8x1xf32>
    %cst_72 = arith.constant 3.200000e+01 : f32
    %133 = vector.broadcast %cst_72 : f32 to vector<8x1xf32>
    %134 = arith.divf %132, %133 : vector<8x1xf32>
    %135 = vector.broadcast %134 : vector<8x1xf32> to vector<8x32xf32>
    %136 = arith.subf %126, %135 : vector<8x32xf32>
    %137 = arith.mulf %136, %136 : vector<8x32xf32>
    %cst_73 = arith.constant dense<0.000000e+00> : vector<8xf32>
    %138 = vector.multi_reduction <add>, %137, %cst_73 [1] : vector<8x32xf32> to vector<8xf32>
    %139 = vector.shape_cast %138 : vector<8xf32> to vector<8x1xf32>
    %cst_74 = arith.constant 3.200000e+01 : f32
    %140 = vector.broadcast %cst_74 : f32 to vector<8x1xf32>
    %141 = arith.divf %139, %140 : vector<8x1xf32>
    %cst_75 = arith.constant 9.99999974E-6 : f32
    %142 = vector.broadcast %cst_75 : f32 to vector<8x1xf32>
    %143 = arith.addf %141, %142 : vector<8x1xf32>
    %144 = math.rsqrt %143 : vector<8x1xf32>
    %145 = vector.broadcast %144 : vector<8x1xf32> to vector<8x32xf32>
    %146 = arith.mulf %136, %145 : vector<8x32xf32>
    %147 = vector.broadcast %128 : vector<1x32xf32> to vector<8x32xf32>
    %148 = arith.mulf %146, %147 : vector<8x32xf32>
    %149 = vector.broadcast %130 : vector<1x32xf32> to vector<8x32xf32>
    %150 = arith.addf %148, %149 : vector<8x32xf32>
    %151 = arith.truncf %150 : vector<8x32xf32> to vector<8x32xbf16>
    %152 = vector.extract_strided_slice %151 {offsets = [7, 0], sizes = [1, 32], strides = [1, 1]} : vector<8x32xbf16> to vector<1x32xbf16>
    %153 = vector.extract_strided_slice %150 {offsets = [7, 0], sizes = [1, 32], strides = [1, 1]} : vector<8x32xf32> to vector<1x32xf32>
    %154 = vector.extract_strided_slice %11 {offsets = [7, 0], sizes = [1, 8], strides = [1, 1]} : vector<8x8xf32> to vector<1x8xf32>
    %c1 = arith.constant 1 : index
    %c0_76 = arith.constant 0 : index
    %c0_77 = arith.constant 0 : index
    %155 = vector.load %arg3[%c1, %c0_76, %c0_77] : memref<2x32x32xbf16, #tpu.memory_space<vmem>>, vector<1x32x32xbf16>
    %156 = vector.shape_cast %155 : vector<1x32x32xbf16> to vector<32x32xbf16>
    %cst_78 = arith.constant dense<0.000000e+00> : vector<1x32xf32>
    %157 = tpu.matmul %152, %156, %cst_78 {dimension_numbers = #tpu.dot_dimension_numbers<[1], [0], [0], [1], [0, 0, 1, 1], [], []>} : vector<1x32xbf16>, vector<32x32xbf16>, vector<1x32xf32> -> vector<1x32xf32>
    %c1_79 = arith.constant 1 : index
    %c0_80 = arith.constant 0 : index
    %c0_81 = arith.constant 0 : index
    %158 = vector.load %arg4[%c1_79, %c0_80, %c0_81] : memref<2x1x32xf32, #tpu.memory_space<vmem>>, vector<1x1x32xf32>
    %159 = vector.shape_cast %158 : vector<1x1x32xf32> to vector<1x32xf32>
    %160 = arith.addf %157, %159 : vector<1x32xf32>
    %c1_82 = arith.constant 1 : index
    %c0_83 = arith.constant 0 : index
    %c0_84 = arith.constant 0 : index
    %161 = vector.load %arg5[%c1_82, %c0_83, %c0_84] : memref<2x32x32xbf16, #tpu.memory_space<vmem>>, vector<1x32x32xbf16>
    %162 = vector.shape_cast %161 : vector<1x32x32xbf16> to vector<32x32xbf16>
    %cst_85 = arith.constant dense<0.000000e+00> : vector<8x32xf32>
    %163 = tpu.matmul %151, %162, %cst_85 {dimension_numbers = #tpu.dot_dimension_numbers<[1], [0], [0], [1], [0, 0, 1, 1], [], []>} : vector<8x32xbf16>, vector<32x32xbf16>, vector<8x32xf32> -> vector<8x32xf32>
    %c1_86 = arith.constant 1 : index
    %c0_87 = arith.constant 0 : index
    %c0_88 = arith.constant 0 : index
    %164 = vector.load %arg6[%c1_86, %c0_87, %c0_88] : memref<2x1x32xf32, #tpu.memory_space<vmem>>, vector<1x1x32xf32>
    %165 = vector.shape_cast %164 : vector<1x1x32xf32> to vector<1x32xf32>
    %166 = vector.broadcast %165 : vector<1x32xf32> to vector<8x32xf32>
    %167 = arith.addf %163, %166 : vector<8x32xf32>
    %c1_89 = arith.constant 1 : index
    %c0_90 = arith.constant 0 : index
    %c0_91 = arith.constant 0 : index
    %168 = vector.load %arg7[%c1_89, %c0_90, %c0_91] : memref<2x32x32xbf16, #tpu.memory_space<vmem>>, vector<1x32x32xbf16>
    %169 = vector.shape_cast %168 : vector<1x32x32xbf16> to vector<32x32xbf16>
    %cst_92 = arith.constant dense<0.000000e+00> : vector<8x32xf32>
    %170 = tpu.matmul %151, %169, %cst_92 {dimension_numbers = #tpu.dot_dimension_numbers<[1], [0], [0], [1], [0, 0, 1, 1], [], []>} : vector<8x32xbf16>, vector<32x32xbf16>, vector<8x32xf32> -> vector<8x32xf32>
    %c1_93 = arith.constant 1 : index
    %c0_94 = arith.constant 0 : index
    %c0_95 = arith.constant 0 : index
    %171 = vector.load %arg8[%c1_93, %c0_94, %c0_95] : memref<2x1x32xf32, #tpu.memory_space<vmem>>, vector<1x1x32xf32>
    %172 = vector.shape_cast %171 : vector<1x1x32xf32> to vector<1x32xf32>
    %173 = vector.broadcast %172 : vector<1x32xf32> to vector<8x32xf32>
    %174 = arith.addf %170, %173 : vector<8x32xf32>
    %175 = arith.truncf %160 : vector<1x32xf32> to vector<1x32xbf16>
    %176 = vector.extract_strided_slice %175 {offsets = [0, 0], sizes = [1, 16], strides = [1, 1]} : vector<1x32xbf16> to vector<1x16xbf16>
    %177 = vector.extract_strided_slice %175 {offsets = [0, 16], sizes = [1, 16], strides = [1, 1]} : vector<1x32xbf16> to vector<1x16xbf16>
    %178 = vector.shape_cast %176 : vector<1x16xbf16> to vector<1x1x16xbf16>
    %179 = vector.shape_cast %177 : vector<1x16xbf16> to vector<1x1x16xbf16>
    %180 = tpu.concatenate %178, %179 in 0 : vector<1x1x16xbf16>, vector<1x1x16xbf16> -> vector<2x1x16xbf16>
    %181 = arith.truncf %167 : vector<8x32xf32> to vector<8x32xbf16>
    %182 = vector.extract_strided_slice %181 {offsets = [0, 0], sizes = [8, 16], strides = [1, 1]} : vector<8x32xbf16> to vector<8x16xbf16>
    %183 = vector.extract_strided_slice %181 {offsets = [0, 16], sizes = [8, 16], strides = [1, 1]} : vector<8x32xbf16> to vector<8x16xbf16>
    %184 = vector.shape_cast %182 : vector<8x16xbf16> to vector<1x8x16xbf16>
    %185 = vector.shape_cast %183 : vector<8x16xbf16> to vector<1x8x16xbf16>
    %186 = tpu.concatenate %184, %185 in 0 : vector<1x8x16xbf16>, vector<1x8x16xbf16> -> vector<2x8x16xbf16>
    %187 = arith.truncf %174 : vector<8x32xf32> to vector<8x32xbf16>
    %188 = vector.extract_strided_slice %187 {offsets = [0, 0], sizes = [8, 16], strides = [1, 1]} : vector<8x32xbf16> to vector<8x16xbf16>
    %189 = vector.extract_strided_slice %187 {offsets = [0, 16], sizes = [8, 16], strides = [1, 1]} : vector<8x32xbf16> to vector<8x16xbf16>
    %190 = vector.shape_cast %188 : vector<8x16xbf16> to vector<1x8x16xbf16>
    %191 = vector.shape_cast %189 : vector<8x16xbf16> to vector<1x8x16xbf16>
    %192 = tpu.concatenate %190, %191 in 0 : vector<1x8x16xbf16>, vector<1x8x16xbf16> -> vector<2x8x16xbf16>
    "tpu.trace_start"() <{level = 10 : i32, message = "hqd,hkd->hqk"}> : () -> ()
    %cst_96 = arith.constant dense<0.000000e+00> : vector<2x1x8xf32>
    %193 = tpu.matmul %180, %186, %cst_96 {dimension_numbers = #tpu.dot_dimension_numbers<[2], [2], [1], [1], [0, 0, 0, 1, 1, 1], [0], [0]>} : vector<2x1x16xbf16>, vector<2x8x16xbf16>, vector<2x1x8xf32> -> vector<2x1x8xf32>
    "tpu.trace_stop"() : () -> ()
    %cst_97 = arith.constant 2.500000e-01 : f32
    %194 = vector.broadcast %cst_97 : f32 to vector<2x1x8xf32>
    %195 = arith.mulf %193, %194 : vector<2x1x8xf32>
    %196 = vector.shape_cast %154 : vector<1x8xf32> to vector<1x1x8xf32>
    %197 = vector.broadcast %196 : vector<1x1x8xf32> to vector<2x1x8xf32>
    %198 = arith.addf %195, %197 : vector<2x1x8xf32>
    %cst_98 = arith.constant dense<0xFF800000> : vector<2x1xf32>
    %199 = vector.multi_reduction <maximumf>, %198, %cst_98 [2] : vector<2x1x8xf32> to vector<2x1xf32>
    %200 = vector.shape_cast %199 : vector<2x1xf32> to vector<2x1x1xf32>
    %201 = vector.broadcast %200 : vector<2x1x1xf32> to vector<2x1x8xf32>
    %202 = arith.subf %198, %201 : vector<2x1x8xf32>
    %203 = math.exp %202 : vector<2x1x8xf32>
    %cst_99 = arith.constant dense<0.000000e+00> : vector<2x1xf32>
    %204 = vector.multi_reduction <add>, %203, %cst_99 [2] : vector<2x1x8xf32> to vector<2x1xf32>
    %205 = vector.shape_cast %204 : vector<2x1xf32> to vector<2x1x1xf32>
    %206 = tpu.reciprocal %205 {approx = true} : vector<2x1x1xf32> -> vector<2x1x1xf32>
    %207 = vector.broadcast %206 : vector<2x1x1xf32> to vector<2x1x8xf32>
    %208 = arith.mulf %203, %207 : vector<2x1x8xf32>
    %209 = arith.truncf %208 : vector<2x1x8xf32> to vector<2x1x8xbf16>
    "tpu.trace_start"() <{level = 10 : i32, message = "hqk,hkd->hqd"}> : () -> ()
    %cst_100 = arith.constant dense<0.000000e+00> : vector<2x1x16xf32>
    %210 = tpu.matmul %209, %192, %cst_100 {dimension_numbers = #tpu.dot_dimension_numbers<[2], [1], [1], [2], [0, 0, 0, 1, 1, 2], [0], [0]>} : vector<2x1x8xbf16>, vector<2x8x16xbf16>, vector<2x1x16xf32> -> vector<2x1x16xf32>
    "tpu.trace_stop"() : () -> ()
    %211 = vector.extract_strided_slice %210 {offsets = [0, 0, 0], sizes = [1, 1, 16], strides = [1, 1, 1]} : vector<2x1x16xf32> to vector<1x1x16xf32>
    %212 = vector.shape_cast %211 : vector<1x1x16xf32> to vector<1x16xf32>
    %213 = vector.extract_strided_slice %210 {offsets = [1, 0, 0], sizes = [1, 1, 16], strides = [1, 1, 1]} : vector<2x1x16xf32> to vector<1x1x16xf32>
    %214 = vector.shape_cast %213 : vector<1x1x16xf32> to vector<1x16xf32>
    %215 = tpu.concatenate %212, %214 in 1 : vector<1x16xf32>, vector<1x16xf32> -> vector<1x32xf32>
    %216 = arith.truncf %215 : vector<1x32xf32> to vector<1x32xbf16>
    %c1_101 = arith.constant 1 : index
    %c0_102 = arith.constant 0 : index
    %c0_103 = arith.constant 0 : index
    %217 = vector.load %arg9[%c1_101, %c0_102, %c0_103] : memref<2x32x32xbf16, #tpu.memory_space<vmem>>, vector<1x32x32xbf16>
    %218 = vector.shape_cast %217 : vector<1x32x32xbf16> to vector<32x32xbf16>
    %cst_104 = arith.constant dense<0.000000e+00> : vector<1x32xf32>
    %219 = tpu.matmul %216, %218, %cst_104 {dimension_numbers = #tpu.dot_dimension_numbers<[1], [0], [0], [1], [0, 0, 1, 1], [], []>} : vector<1x32xbf16>, vector<32x32xbf16>, vector<1x32xf32> -> vector<1x32xf32>
    %c1_105 = arith.constant 1 : index
    %c0_106 = arith.constant 0 : index
    %c0_107 = arith.constant 0 : index
    %220 = vector.load %arg10[%c1_105, %c0_106, %c0_107] : memref<2x1x32xf32, #tpu.memory_space<vmem>>, vector<1x1x32xf32>
    %221 = vector.shape_cast %220 : vector<1x1x32xf32> to vector<1x32xf32>
    %222 = arith.addf %219, %221 : vector<1x32xf32>
    %223 = arith.addf %153, %222 : vector<1x32xf32>
    %c1_108 = arith.constant 1 : index
    %c0_109 = arith.constant 0 : index
    %c0_110 = arith.constant 0 : index
    %224 = vector.load %arg11[%c1_108, %c0_109, %c0_110] : memref<2x1x32xf32, #tpu.memory_space<vmem>>, vector<1x1x32xf32>
    %225 = vector.shape_cast %224 : vector<1x1x32xf32> to vector<1x32xf32>
    %c1_111 = arith.constant 1 : index
    %c0_112 = arith.constant 0 : index
    %c0_113 = arith.constant 0 : index
    %226 = vector.load %arg12[%c1_111, %c0_112, %c0_113] : memref<2x1x32xf32, #tpu.memory_space<vmem>>, vector<1x1x32xf32>
    %227 = vector.shape_cast %226 : vector<1x1x32xf32> to vector<1x32xf32>
    %cst_114 = arith.constant dense<0.000000e+00> : vector<1xf32>
    %228 = vector.multi_reduction <add>, %223, %cst_114 [1] : vector<1x32xf32> to vector<1xf32>
    %229 = vector.shape_cast %228 : vector<1xf32> to vector<1x1xf32>
    %cst_115 = arith.constant 3.200000e+01 : f32
    %230 = vector.broadcast %cst_115 : f32 to vector<1x1xf32>
    %231 = arith.divf %229, %230 : vector<1x1xf32>
    %232 = vector.broadcast %231 : vector<1x1xf32> to vector<1x32xf32>
    %233 = arith.subf %223, %232 : vector<1x32xf32>
    %234 = arith.mulf %233, %233 : vector<1x32xf32>
    %cst_116 = arith.constant dense<0.000000e+00> : vector<1xf32>
    %235 = vector.multi_reduction <add>, %234, %cst_116 [1] : vector<1x32xf32> to vector<1xf32>
    %236 = vector.shape_cast %235 : vector<1xf32> to vector<1x1xf32>
    %cst_117 = arith.constant 3.200000e+01 : f32
    %237 = vector.broadcast %cst_117 : f32 to vector<1x1xf32>
    %238 = arith.divf %236, %237 : vector<1x1xf32>
    %cst_118 = arith.constant 9.99999974E-6 : f32
    %239 = vector.broadcast %cst_118 : f32 to vector<1x1xf32>
    %240 = arith.addf %238, %239 : vector<1x1xf32>
    %241 = math.rsqrt %240 : vector<1x1xf32>
    %242 = vector.broadcast %241 : vector<1x1xf32> to vector<1x32xf32>
    %243 = arith.mulf %233, %242 : vector<1x32xf32>
    %244 = arith.mulf %243, %225 : vector<1x32xf32>
    %245 = arith.addf %244, %227 : vector<1x32xf32>
    %246 = arith.truncf %245 : vector<1x32xf32> to vector<1x32xbf16>
    %c1_119 = arith.constant 1 : index
    %c0_120 = arith.constant 0 : index
    %c0_121 = arith.constant 0 : index
    %247 = vector.load %arg13[%c1_119, %c0_120, %c0_121] : memref<2x32x64xbf16, #tpu.memory_space<vmem>>, vector<1x32x64xbf16>
    %248 = vector.shape_cast %247 : vector<1x32x64xbf16> to vector<32x64xbf16>
    %cst_122 = arith.constant dense<0.000000e+00> : vector<1x64xf32>
    %249 = tpu.matmul %246, %248, %cst_122 {dimension_numbers = #tpu.dot_dimension_numbers<[1], [0], [0], [1], [0, 0, 1, 1], [], []>} : vector<1x32xbf16>, vector<32x64xbf16>, vector<1x64xf32> -> vector<1x64xf32>
    %c1_123 = arith.constant 1 : index
    %c0_124 = arith.constant 0 : index
    %c0_125 = arith.constant 0 : index
    %250 = vector.load %arg14[%c1_123, %c0_124, %c0_125] : memref<2x1x64xf32, #tpu.memory_space<vmem>>, vector<1x1x64xf32>
    %251 = vector.shape_cast %250 : vector<1x1x64xf32> to vector<1x64xf32>
    %252 = arith.addf %249, %251 : vector<1x64xf32>
    %cst_126 = arith.constant 0.000000e+00 : f32
    %253 = vector.broadcast %cst_126 : f32 to vector<1x64xf32>
    %254 = arith.maximumf %252, %253 : vector<1x64xf32>
    %255 = arith.truncf %254 : vector<1x64xf32> to vector<1x64xbf16>
    %c1_127 = arith.constant 1 : index
    %c0_128 = arith.constant 0 : index
    %c0_129 = arith.constant 0 : index
    %256 = vector.load %arg15[%c1_127, %c0_128, %c0_129] : memref<2x64x32xbf16, #tpu.memory_space<vmem>>, vector<1x64x32xbf16>
    %257 = vector.shape_cast %256 : vector<1x64x32xbf16> to vector<64x32xbf16>
    %cst_130 = arith.constant dense<0.000000e+00> : vector<1x32xf32>
    %258 = tpu.matmul %255, %257, %cst_130 {dimension_numbers = #tpu.dot_dimension_numbers<[1], [0], [0], [1], [0, 0, 1, 1], [], []>} : vector<1x64xbf16>, vector<64x32xbf16>, vector<1x32xf32> -> vector<1x32xf32>
    %c1_131 = arith.constant 1 : index
    %c0_132 = arith.constant 0 : index
    %c0_133 = arith.constant 0 : index
    %259 = vector.load %arg16[%c1_131, %c0_132, %c0_133] : memref<2x1x32xf32, #tpu.memory_space<vmem>>, vector<1x1x32xf32>
    %260 = vector.shape_cast %259 : vector<1x1x32xf32> to vector<1x32xf32>
    %261 = arith.addf %258, %260 : vector<1x32xf32>
    %262 = arith.addf %245, %261 : vector<1x32xf32>
    %c1_134 = arith.constant 1 : index
    %c0_135 = arith.constant 0 : index
    %c0_136 = arith.constant 0 : index
    %263 = vector.load %arg17[%c1_134, %c0_135, %c0_136] : memref<2x1x32xf32, #tpu.memory_space<vmem>>, vector<1x1x32xf32>
    %264 = vector.shape_cast %263 : vector<1x1x32xf32> to vector<1x32xf32>
    %c1_137 = arith.constant 1 : index
    %c0_138 = arith.constant 0 : index
    %c0_139 = arith.constant 0 : index
    %265 = vector.load %arg18[%c1_137, %c0_138, %c0_139] : memref<2x1x32xf32, #tpu.memory_space<vmem>>, vector<1x1x32xf32>
    %266 = vector.shape_cast %265 : vector<1x1x32xf32> to vector<1x32xf32>
    %cst_140 = arith.constant dense<0.000000e+00> : vector<1xf32>
    %267 = vector.multi_reduction <add>, %262, %cst_140 [1] : vector<1x32xf32> to vector<1xf32>
    %268 = vector.shape_cast %267 : vector<1xf32> to vector<1x1xf32>
    %cst_141 = arith.constant 3.200000e+01 : f32
    %269 = vector.broadcast %cst_141 : f32 to vector<1x1xf32>
    %270 = arith.divf %268, %269 : vector<1x1xf32>
    %271 = vector.broadcast %270 : vector<1x1xf32> to vector<1x32xf32>
    %272 = arith.subf %262, %271 : vector<1x32xf32>
    %273 = arith.mulf %272, %272 : vector<1x32xf32>
    %cst_142 = arith.constant dense<0.000000e+00> : vector<1xf32>
    %274 = vector.multi_reduction <add>, %273, %cst_142 [1] : vector<1x32xf32> to vector<1xf32>
    %275 = vector.shape_cast %274 : vector<1xf32> to vector<1x1xf32>
    %cst_143 = arith.constant 3.200000e+01 : f32
    %276 = vector.broadcast %cst_143 : f32 to vector<1x1xf32>
    %277 = arith.divf %275, %276 : vector<1x1xf32>
    %cst_144 = arith.constant 9.99999974E-6 : f32
    %278 = vector.broadcast %cst_144 : f32 to vector<1x1xf32>
    %279 = arith.addf %277, %278 : vector<1x1xf32>
    %280 = math.rsqrt %279 : vector<1x1xf32>
    %281 = vector.broadcast %280 : vector<1x1xf32> to vector<1x32xf32>
    %282 = arith.mulf %272, %281 : vector<1x32xf32>
    %283 = arith.mulf %282, %264 : vector<1x32xf32>
    %284 = arith.addf %283, %266 : vector<1x32xf32>
    %c0_145 = arith.constant 0 : index
    %c0_146 = arith.constant 0 : index
    %c0_147 = arith.constant 0 : index
    %285 = vector.load %arg19[%c0_145, %c0_146, %c0_147] : memref<1x1x32xf32, #tpu.memory_space<vmem>>, vector<1x1x32xf32>
    %286 = vector.shape_cast %285 : vector<1x1x32xf32> to vector<1x32xf32>
    %287 = vector.shape_cast %284 : vector<1x32xf32> to vector<1x1x32xf32>
    tpu.vector_store %arg19[%c0_145, %c0_146, %c0_147], %287 {strides = array<i32>} : memref<1x1x32xf32, #tpu.memory_space<vmem>>, vector<1x1x32xf32>,
    return
  }
  func.func @transform_0(%arg0: i32) -> (i32, i32, i32) {
    %c0_i32 = arith.constant 0 : i32
    %c0_i32_0 = arith.constant 0 : i32
    %c0_i32_1 = arith.constant 0 : i32
    return %arg0, %c0_i32, %c0_i32_0 : i32, i32, i32
  }
  func.func @transform_1(%arg0: i32) -> (i32, i32, i32) {
    %c0_i32 = arith.constant 0 : i32
    %c0_i32_0 = arith.constant 0 : i32
    %c0_i32_1 = arith.constant 0 : i32
    return %arg0, %c0_i32, %c0_i32_0 : i32, i32, i32
  }
  func.func @transform_2(%arg0: i32) -> (i32, i32, i32) {
    %c0_i32 = arith.constant 0 : i32
    %c0_i32_0 = arith.constant 0 : i32
    %c0_i32_1 = arith.constant 0 : i32
    %c0_i32_2 = arith.constant 0 : i32
    return %c0_i32, %c0_i32_0, %c0_i32_1 : i32, i32, i32
  }
  func.func @transform_3(%arg0: i32) -> (i32, i32, i32) {
    %c0_i32 = arith.constant 0 : i32
    %c0_i32_0 = arith.constant 0 : i32
    %c0_i32_1 = arith.constant 0 : i32
    %c0_i32_2 = arith.constant 0 : i32
    return %c0_i32, %c0_i32_0, %c0_i32_1 : i32, i32, i32
  }
  func.func @transform_4(%arg0: i32) -> (i32, i32, i32) {
    %c0_i32 = arith.constant 0 : i32
    %c0_i32_0 = arith.constant 0 : i32
    %c0_i32_1 = arith.constant 0 : i32
    %c0_i32_2 = arith.constant 0 : i32
    return %c0_i32, %c0_i32_0, %c0_i32_1 : i32, i32, i32
  }
  func.func @transform_5(%arg0: i32) -> (i32, i32, i32) {
    %c0_i32 = arith.constant 0 : i32
    %c0_i32_0 = arith.constant 0 : i32
    %c0_i32_1 = arith.constant 0 : i32
    %c0_i32_2 = arith.constant 0 : i32
    return %c0_i32, %c0_i32_0, %c0_i32_1 : i32, i32, i32
  }
  func.func @transform_6(%arg0: i32) -> (i32, i32, i32) {
    %c0_i32 = arith.constant 0 : i32
    %c0_i32_0 = arith.constant 0 : i32
    %c0_i32_1 = arith.constant 0 : i32
    %c0_i32_2 = arith.constant 0 : i32
    return %c0_i32, %c0_i32_0, %c0_i32_1 : i32, i32, i32
  }
  func.func @transform_7(%arg0: i32) -> (i32, i32, i32) {
    %c0_i32 = arith.constant 0 : i32
    %c0_i32_0 = arith.constant 0 : i32
    %c0_i32_1 = arith.constant 0 : i32
    %c0_i32_2 = arith.constant 0 : i32
    return %c0_i32, %c0_i32_0, %c0_i32_1 : i32, i32, i32
  }
  func.func @transform_8(%arg0: i32) -> (i32, i32, i32) {
    %c0_i32 = arith.constant 0 : i32
    %c0_i32_0 = arith.constant 0 : i32
    %c0_i32_1 = arith.constant 0 : i32
    %c0_i32_2 = arith.constant 0 : i32
    return %c0_i32, %c0_i32_0, %c0_i32_1 : i32, i32, i32
  }
  func.func @transform_9(%arg0: i32) -> (i32, i32, i32) {
    %c0_i32 = arith.constant 0 : i32
    %c0_i32_0 = arith.constant 0 : i32
    %c0_i32_1 = arith.constant 0 : i32
    %c0_i32_2 = arith.constant 0 : i32
    return %c0_i32, %c0_i32_0, %c0_i32_1 : i32, i32, i32
  }
  func.func @transform_10(%arg0: i32) -> (i32, i32, i32) {
    %c0_i32 = arith.constant 0 : i32
    %c0_i32_0 = arith.constant 0 : i32
    %c0_i32_1 = arith.constant 0 : i32
    %c0_i32_2 = arith.constant 0 : i32
    return %c0_i32, %c0_i32_0, %c0_i32_1 : i32, i32, i32
  }
  func.func @transform_11(%arg0: i32) -> (i32, i32, i32) {
    %c0_i32 = arith.constant 0 : i32
    %c0_i32_0 = arith.constant 0 : i32
    %c0_i32_1 = arith.constant 0 : i32
    %c0_i32_2 = arith.constant 0 : i32
    return %c0_i32, %c0_i32_0, %c0_i32_1 : i32, i32, i32
  }
  func.func @transform_12(%arg0: i32) -> (i32, i32, i32) {
    %c0_i32 = arith.constant 0 : i32
    %c0_i32_0 = arith.constant 0 : i32
    %c0_i32_1 = arith.constant 0 : i32
    %c0_i32_2 = arith.constant 0 : i32
    return %c0_i32, %c0_i32_0, %c0_i32_1 : i32, i32, i32
  }
  func.func @transform_13(%arg0: i32) -> (i32, i32, i32) {
    %c0_i32 = arith.constant 0 : i32
    %c0_i32_0 = arith.constant 0 : i32
    %c0_i32_1 = arith.constant 0 : i32
    %c0_i32_2 = arith.constant 0 : i32
    return %c0_i32, %c0_i32_0, %c0_i32_1 : i32, i32, i32
  }
  func.func @transform_14(%arg0: i32) -> (i32, i32, i32) {
    %c0_i32 = arith.constant 0 : i32
    %c0_i32_0 = arith.constant 0 : i32
    %c0_i32_1 = arith.constant 0 : i32
    %c0_i32_2 = arith.constant 0 : i32
    return %c0_i32, %c0_i32_0, %c0_i32_1 : i32, i32, i32
  }
  func.func @transform_15(%arg0: i32) -> (i32, i32, i32) {
    %c0_i32 = arith.constant 0 : i32
    %c0_i32_0 = arith.constant 0 : i32
    %c0_i32_1 = arith.constant 0 : i32
    %c0_i32_2 = arith.constant 0 : i32
    return %c0_i32, %c0_i32_0, %c0_i32_1 : i32, i32, i32
  }
  func.func @transform_16(%arg0: i32) -> (i32, i32, i32) {
    %c0_i32 = arith.constant 0 : i32
    %c0_i32_0 = arith.constant 0 : i32
    %c0_i32_1 = arith.constant 0 : i32
    %c0_i32_2 = arith.constant 0 : i32
    return %c0_i32, %c0_i32_0, %c0_i32_1 : i32, i32, i32
  }
  func.func @transform_17(%arg0: i32) -> (i32, i32, i32) {
    %c0_i32 = arith.constant 0 : i32
    %c0_i32_0 = arith.constant 0 : i32
    %c0_i32_1 = arith.constant 0 : i32
    %c0_i32_2 = arith.constant 0 : i32
    return %c0_i32, %c0_i32_0, %c0_i32_1 : i32, i32, i32
  }
  func.func @transform_18(%arg0: i32) -> (i32, i32, i32) {
    %c0_i32 = arith.constant 0 : i32
    %c0_i32_0 = arith.constant 0 : i32
    %c0_i32_1 = arith.constant 0 : i32
    return %arg0, %c0_i32, %c0_i32_0 : i32, i32, i32
  }
}

</mosaic_0001>

<bundles_post_ra>
// kernel: tpu_custom_call.1
= control target key start
LH: loop header
LB: loop body
LE: loop exit
PB: predicated region body
PF: predicated region fallthrough
CT: control target
= control target key end

     0   :  { %s3383_s0 = inlined_call_operand.hbm [shape: f32[2,8,32], index: 0, kind: input, shape index: {}]   ;;  %s3384_s1 = inlined_call_operand.vmem [shape: f32[2,1,8], index: 1, kind: input, shape index: {}]   ;;  %s3385_s2 = inlined_call_operand.vmem [shape: bf16[2,32,32], index: 2, kind: input, shape index: {}]   ;;  %s3386_s3 = inlined_call_operand.vmem [shape: f32[2,1,32], index: 3, kind: input, shape index: {}]   ;;  %s3387_s4 = inlined_call_operand.vmem [shape: bf16[2,32,32], index: 4, kind: input, shape index: {}]   ;;  %s3388_s5 = inlined_call_operand.vmem [shape: f32[2,1,32], index: 5, kind: input, shape index: {}]   ;;  %s3389_s6 = inlined_call_operand.vmem [shape: bf16[2,32,32], index: 6, kind: input, shape index: {}]   ;;  %s3390_s7 = inlined_call_operand.vmem [shape: f32[2,1,32], index: 7, kind: input, shape index: {}]   ;;  %s3391_s8 = inlined_call_operand.hbm [shape: bf16[2,32,32], index: 8, kind: input, shape index: {}]   ;;  %s3392_s9 = inlined_call_operand.vmem [shape: f32[2,1,32], index: 9, kind: input, shape index: {}]   ;;  %s3393_s10 = inlined_call_operand.vmem [shape: f32[2,1,32], index: 10, kind: input, shape index: {}]   ;;  %s3394_s11 = inlined_call_operand.vmem [shape: f32[2,1,32], index: 11, kind: input, shape index: {}]   ;;  %s3395_s12 = inlined_call_operand.hbm [shape: bf16[2,32,64], index: 12, kind: input, shape index: {}]   ;;  %s3396_s13 = inlined_call_operand.vmem [shape: f32[2,1,64], index: 13, kind: input, shape index: {}]   ;;  %s3397_s14 = inlined_call_operand.vmem [shape: bf16[2,64,32], index: 14, kind: input, shape index: {}]   ;;  %s3398_s15 = inlined_call_operand.vmem [shape: f32[2,1,32], index: 15, kind: input, shape index: {}]   ;;  %s3399_s16 = inlined_call_operand.vmem [shape: f32[2,1,32], index: 16, kind: input, shape index: {}]   ;;  %s3400_s17 = inlined_call_operand.vmem [shape: f32[2,1,32], index: 17, kind: input, shape index: {}]   ;;  %s3401_s18 = inlined_call_operand.hbm [shape: f32[2,1,32], index: 18, kind: output, shape index: {}]  }
   0x1   :  { %3417 = sst [smem:[#allocation14_spill]] %s3383_s0 }
   0x2   :  { %3418 = sst [smem:[#allocation15_spill]] %s3384_s1 }
   0x3   :  { %3419 = sst [smem:[#allocation16_spill]] %s3385_s2 }
   0x4   :  { %3420 = sst [smem:[#allocation17_spill]] %s3386_s3 }
   0x5   :  { %3421 = sst [smem:[#allocation18_spill]] %s3387_s4 }
   0x6   :  { %3422 = sst [smem:[#allocation19_spill]] %s3391_s8 }
   0x7   :  { %3423 = sst [smem:[#allocation20_spill]] %s3396_s13 }
   0x8   :  { %3424 = sst [smem:[#allocation21_spill]] %s3398_s15 }
   0x9   :  { %3425 = sst [smem:[#allocation22_spill]] %s3399_s16 }
   0xa   :  { %3426 = sst [smem:[#allocation23_spill]] %s3400_s17 }
   0xb   :  { %3427 = sst [smem:[#allocation24_spill]] %s3401_s18 }
   0xc   :  { %23 = vsyncpa [#allocation3], 0 }
   0xd   :  { %25 = vsyncpa [#allocation3 + $0x1], 0 }
   0xe   :  { %26 = vsyncpa [#allocation6], 0 }
   0xf   :  { %27 = vsyncpa [#allocation4], 0 }
  0x10   :  { %29 = vsyncpa [#allocation4 + $0x1], 0  ;;  %s2881_s27 = smov 0   ;;  %s2883_s28 = smov 0  }
  0x11   :  { %s2885_s29 = smov 0   ;;  %s2887_s30 = smov 0  }
  0x12 LB: > { %3428 = sst [smem:[#allocation12_spill]] %s2762_s27  ;;  %s2902_s0 = sadd.s32 4294967295, %s2774_s30   ;;  %s2774_s30 = sphi %s2887_s30, %s3461_s30   ;;  %s2770_s29 = sphi %s2885_s29, %s3460_s29   ;;  %s2766_s28 = sphi %s2883_s28, %s3459_s28   ;;  %s2762_s27 = sphi %s2881_s27, %s3458_s27  }
  0x13   : > { %s2176_s19 = sadd.s32 4294967294, %s2774_s30   ;;  %p55_p0 = scmp.ne.s32.totalorder %s2766_s28, %s2762_s27 }
  0x14   : > { %p3408_p1 = scmp.eq.s32.totalorder %s2902_s0, 0  ;;  %p447_p3 = scmp.eq.s32.totalorder %s2176_s19, 1 }
  0x15   : > { %p2177_p5 = scmp.ge.s32.totalorder %s2774_s30, 1  ;;  %p454_p7 = scmp.lt.s32.totalorder %s2774_s30, 3 }
  0x16   : > { %p2911_p4 = por %p3408_p1, %p55_p0  ;;  %p2916_p6 = por %p447_p3, %p55_p0 }
  0x17   : > { %p2921_p8 = pnand %p2177_p5, %p454_p7  ;;  %s2776_s22 = smov [#allocation5]  }
  0x18   : > { %s3429_s1 = scalar_select %p2911_p4, 1, 0 }
  0x19   : > { %s3430_s20 = scalar_select %p2916_p6, 1, 0 }
  0x1a   : > { %s484_s2 = sshll.u32 %s2776_s22, 4  ;;  %p2505_p9 = pneg %p2921_p8  ;;  %s2925_s2 = int_to_ptr.vmem [resolvable:$true] %s484_s2 }
  0x1b   : > { %3431 = sst [smem:[#allocation13_spill]] %s3430_s20  ;;  %s2777_s24 = smov [#allocation7]  }
  0x1c   : > { %p2932_p11 = pnand %p2505_p9, %p3408_p1  ;;  %s506_s25 = sshll.u32 %s2777_s24, 4  ;;  %s2936_s25 = int_to_ptr.vmem [resolvable:$true] %s506_s25 }
  0x1d   : > { %s3434_s8 = sld [smem:[#allocation19_spill]] }
  0x1e   : > { %p2620_p13 = pneg %p2932_p11 }
  0x23   : > { %s2618_s22 = scalar_lea.hbm %s3434_s8, 512 }
  0x24   : > { %p2619_p12 = scmp.ne.s32.totalorder %s3434_s8, %s2618_s22  ;;  %p2625_p5 = scmp.lt.u32.totalorder %s2618_s22, %s3434_s8 }
  0x26   : > { %p2621_p0 = pnand %p2620_p13, %p2619_p12 }
  0x28   : > { %p2622_p3 = pneg %p2621_p0 }
  0x2a   : > { %p2627_p7 = pnand %p2625_p5, %p2622_p3 }
  0x2c   : > { %2630 = shalt.err (!%p2627_p7)
}
  0x2d   : > { %s2631_s24 = scalar_lea.vmem %s2925_s2, 512  ;;  %p2639_p2 = scmp.lt.s32.totalorder %s2925_s2, %s2925_s2 }
  0x2e   : > { %p2632_p9 = scmp.ne.s32.totalorder %s2925_s2, %s2631_s24  ;;  %p2640_p12 = scmp.lt.s32.totalorder %s2631_s24, %s2631_s24 }
  0x30   : > { %p2634_p10 = pnand %p2632_p9, %p2620_p13  ;;  %p2641_p0 = por %p2640_p12, %p2639_p2 }
  0x32   : > { %p2635_p1 = pneg %p2634_p10 }
  0x34   : > { %p2642_p6 = pnand %p2641_p0, %p2635_p1 }
  0x36   : > { %2645 = shalt.err (!%p2642_p6)
}
  0x37   : > { %s2778_s17 = smov 64   ;;  %s2779_s18 = smov 4  }
  0x38   : > { %2508 = dma.hbm_to_vmem [thread:$0]  (!%p2932_p11), %s3434_s8, 512, %s2925_s2, [#allocation6], %s2778_s17, %s2778_s17, %s2779_s18  }
  0x39   : > { %s2646_s22 = scalar_lea.hbm %s3395_s12, 512 }
  0x3a   : > { %p2647_p2 = scmp.ne.s32.totalorder %s3395_s12, %s2646_s22  ;;  %p2653_p10 = scmp.lt.u32.totalorder %s2646_s22, %s3395_s12 }
  0x3c   : > { %p2649_p1 = pnand %p2647_p2, %p2620_p13 }
  0x3e   : > { %p2650_p6 = pneg %p2649_p1 }
  0x40   : > { %p2655_p3 = pnand %p2653_p10, %p2650_p6 }
  0x42   : > { %2658 = shalt.err (!%p2655_p3)
}
  0x43   : > { %s2659_s2 = scalar_lea.vmem %s2936_s25, 512  ;;  %p2667_p12 = scmp.lt.s32.totalorder %s2936_s25, %s2936_s25 }
  0x44   : > { %p2660_p5 = scmp.ne.s32.totalorder %s2936_s25, %s2659_s2  ;;  %p2668_p0 = scmp.lt.s32.totalorder %s2659_s2, %s2659_s2 }
  0x46   : > { %p2662_p7 = pnand %p2660_p5, %p2620_p13  ;;  %p2669_p2 = por %p2668_p0, %p2667_p12 }
  0x48   : > { %p2663_p9 = pneg %p2662_p7 }
  0x4a   : > { %p2670_p1 = pnand %p2669_p2, %p2663_p9 }
  0x4c   : > { %2673 = shalt.err (!%p2670_p1)
}
  0x4d   : > { %2511 = dma.hbm_to_vmem [thread:$0]  (!%p2932_p11), %s3395_s12, 512, %s2936_s25, [#allocation6], %s2778_s17, %s2778_s17, %s2779_s18  }
  0x4e   : > { %s2991_s16 = sadd.s32 1, %s2774_s30   ;;  %s42_s23 = sadd.s32 1, %s2770_s29 }
  0x4f   : > { %s39_s27 = ssub.s32 %s2774_s30, %s2991_s16  ;;  %p49_p13 = scmp.ne.s32.totalorder %s2770_s29, %s2766_s28 }
  0x50   : > { %p40_p6 = scmp.eq.s32.totalorder %s39_s27, 0  ;;  %p50_p10 = scmp.eq.s32.totalorder %s2774_s30, 0 }
  0x51   : > { %p3435_p3 = scmp.eq.s32.totalorder %s2902_s0, 1  ;;  %p2522_p7 = scmp.lt.s32.totalorder %s2774_s30, 2 }
  0x52   : > { %s3007_s26 = scalar_select %p40_p6, %s2770_s29, %s42_s23  }
  0x53   : > { %p3001_p5 = por %p3435_p3, %p49_p13  ;;  %p51_p9 = por %p50_p10, %p49_p13 }
  0x54   : > { %s535_s19 = sand.u32 1, %s2770_s29   ;;  %s2182_s25 = sshll.u32 %s2774_s30, 7 }
  0x55   : > { %s3436_s20 = scalar_select %p3001_p5, 1, 0 }
  0x56   : > { %s2181_s22 = sshll.u32 %s535_s19, 3  ;;  %s3437_s24 = sld [smem:[#allocation14_spill]] }
  0x57   : > { %s539_s13 = scalar_lea.vmem [#allocation2], %s2181_s22  ;;  %p3018_p11 = pnand %p2522_p7, %p51_p9 }
  0x58   : > { %s546_s15 = sshll.u32 %s539_s13, 4  ;;  %s536_s27 = scalar_lea.sflag [#allocation3], %s535_s19  ;;  %s3016_s15 = int_to_ptr.vmem [resolvable:$true] %s546_s15 }
  0x59   : > { %p2676_p0 = pneg %p3018_p11 }
  0x5c   : > { %s3014_s2 = scalar_lea.hbm %s3437_s24, %s2182_s25  ;;  %s2679_s17 = scalar_lea.hbm %s3437_s24, 256 }
  0x5d   : > { %s2674_s8 = scalar_lea.hbm %s3014_s2, 128  ;;  %p2680_p13 = scmp.lt.u32.totalorder %s3014_s2, %s3437_s24 }
  0x5e   : > { %p2675_p12 = scmp.ne.s32.totalorder %s3014_s2, %s2674_s8  ;;  %p2681_p6 = scmp.lt.u32.totalorder %s2679_s17, %s2674_s8 }
  0x5f   : > { %p2683_p3 = scmp.lt.u32.totalorder %s2674_s8, %s3014_s2 }
  0x60   : > { %p2677_p2 = pnand %p2676_p0, %p2675_p12  ;;  %p2682_p10 = por %p2681_p6, %p2680_p13 }
  0x62   : > { %p2678_p1 = pneg %p2677_p2  ;;  %p2684_p7 = por %p2683_p3, %p2682_p10 }
  0x64   : > { %p2685_p9 = pnand %p2684_p7, %p2678_p1 }
  0x66   : > { %2688 = shalt.err (!%p2685_p9)
}
  0x67   : > { %s2689_s19 = scalar_lea.vmem %s3016_s15, 128  ;;  %s2780_s25 = smov [#allocation2]  }
  0x68   : > { %p2690_p12 = scmp.ne.s32.totalorder %s3016_s15, %s2689_s19  ;;  %s2694_s22 = sshll.u32 %s2780_s25, 4  ;;  %s2695_s22 = int_to_ptr.vmem [resolvable:$false] %s2694_s22 }
  0x69   : > { %s2696_s18 = scalar_lea.vmem %s2695_s22, 256  ;;  %p2697_p4 = scmp.lt.s32.totalorder %s3016_s15, %s2695_s22 }
  0x6a   : > { %p2692_p2 = pnand %p2690_p12, %p2676_p0  ;;  %p2698_p13 = scmp.lt.s32.totalorder %s2696_s18, %s2689_s19 }
  0x6c   : > { %p2693_p5 = pneg %p2692_p2  ;;  %p2699_p6 = por %p2698_p13, %p2697_p4 }
  0x6e   : > { %p2700_p10 = pnand %p2699_p6, %p2693_p5 }
  0x70   : > { %2703 = shalt.err (!%p2700_p10)
}
  0x71   : > { %2515 = dma.hbm_to_vmem [thread:$0]  (!%p3018_p11), %s3014_s2, 128, %s3016_s15, %s536_s27  }
  0x72   : > { %561 = sbr.rel (%p2921_p8) target bundleno = 5141 (0x1415), region = 92  ;;  %s3050_s8 = sand.u32 (!%p2921_p8), 1, %s2766_s28  }
  0x73   : > { %s2184_s17 = sshll.u32 (!%p2921_p8), %s3050_s8, 3  ;;  %s564_s13 = scalar_lea.sflag (!%p2921_p8), [#allocation3], %s3050_s8 }
  0x74   : > { %s567_s19 = scalar_lea.vmem (!%p2921_p8), [#allocation2], %s2184_s17  ;;  %p3439_p4 = scmp.ne.s32.totalorder (!%p2921_p8), %s3429_s1, 0 }
  0x79   : > { %2749 = dma.done.wait (%p3439_p4), %s564_s13, 128  }
  0x7a   : > { %2751 = vsyncadd (%p3439_p4), %s564_s13, 4294967168  ;;  %p3440_p5 = scmp.eq.s32.totalorder %s2902_s0, 0 }
  0x7c   : > { %2753 = dma.done.wait (%p3440_p5), [#allocation6], 1024   ;;  %p3441_p11 = pmov %p3440_p5 }
  0x7d   : > { %v2781_v0 = vmov 0.0   ;;  %vm2782_vm0 = vmmov 0   ;;  %s3442_s2 = sld [smem:[#allocation16_spill]]  ;;  %v3074_v3 = vld [vmem:[%s567_s19] sm:$0xff]  ;;  %vm673_vm1 = vcmask 261120   ;;  %s3443_s4 = sld [smem:[#allocation18_spill]]  ;;  %v636_v39 = vlaneseq }
  0x7e   : > { %2755 = vsyncadd (%p3441_p11), [#allocation6], 4294966272  ;;  %2341 = vmatprep.subr.bf16.mxu1 %v2781_v0  ;;  %2345 = vmatprep.mubr.msk.bf16.mxu1 %vm2782_vm0, %v2781_v0  ;;  %v649_v5 = vpack.c.bf16 %v3074_v3, %v3074_v3  ;;  %v2570_v7 = vld [vmem:[%s3389_s6] sm:$0xff]   ;;  %v2571_v8 = vld [vmem:[%s3389_s6 + $0x8] sm:$0xff]   ;;  %s3444_s3 = sld [smem:[#allocation17_spill]]  ;;  %vm855_vm2 = vcmask 130048  }
  0x7f   : > { %2357 = vmatprep.subr.bf16.mxu0 %v2781_v0  ;;  %2361 = vmatprep.mubr.msk.bf16.mxu0 %vm2782_vm0, %v2781_v0  ;;  %v2192_v13 = vld [vmem:[%s3388_s5] ss:$0 sm:$0xff]  ;;  %s2783_s25 = smov 112   ;;  %vm980_vm3 = vcmask 1043456   ;;  %p630_p8 = scmp.lt.s32.totalorder %s2902_s0, 1  ;;  %v637_v40 = vshrl.u32 %v636_v39, 7 }
  0x80   : > { %2358 = vmatpush3.bf16.msra.mxu0 %v2570_v7  ;;  %v2196_v24 = vld [vmem:[%s3390_s7] ss:$0 sm:$0xff]  ;;  %v639_v41 = vand.u32 127, %v636_v39  ;;  %s3445_s1 = sld [smem:[#allocation15_spill]]  ;;  %vm952_vm5 = vcmask 64512   ;;  %s3414_s15 = smov 16  }
  0x81   : > { %2359 = vmatprep.subr.bf16.mxu0 %v2781_v0  ;;  %s631_s17 = scalar_select %p630_p8, %s2902_s0, 1  ;;  %v2574_v39 = vld [vmem:[#allocation7] sm:$0xff]   ;;  %vm1281_vm6 = vcmask 523264   ;;  %vm1665_vm7 = vcmask 57344   ;;  %vm1858_vm8 = vcmask 261127  }
  0x82   : > { %vm640_vm4 = vcmp.gt.s32.totalorder %v639_v41, %v637_v40  ;;  %v2575_v40 = vld [vmem:[#allocation7 + $0x8] sm:$0xff]   ;;  %v2577_v41 = vld [vmem:[%s3397_s14 + $0x8] sm:$0xff]   ;;  %s3447_s27 = sld [smem:[#allocation21_spill]]  ;;  %s3449_s19 = sld [smem:[#allocation22_spill]] }
  0x83   : > { %v2566_v1 = vld [vmem:[%s3442_s2] sm:$0xff]   ;;  %v2567_v2 = vld [vmem:[%s3442_s2 + $0x8] sm:$0xff]   ;;  %v641_v43 = vsel %vm640_vm4, -1e+09, %v2781_v0  ;;  %s2282_s23 = sshll.u32 %s2902_s0, 4  ;;  %p3453_p1 = scmp.ne.s32.totalorder %s3436_s20, 0 }
  0x84   : > { %2342 = vmatpush3.bf16.msra.mxu1 %v2566_v1  ;;  %v2568_v4 = vld [vmem:[%s3443_s4] sm:$0xff]   ;;  %v2569_v6 = vld [vmem:[%s3443_s4 + $0x8] sm:$0xff]   ;;  %2360 = vmatpush3.bf16.msra.mxu0 %v2571_v8  ;;  %s2785_s0 = smov [#allocation8]  }
  0x85   : > { %2343 = vmatprep.subr.bf16.mxu1 %v2781_v0  ;;  %2371 = vmatprep.subr.bf16.mxu0 %v2781_v0  ;;  %v2188_v14 = vld [vmem:[%s3444_s3] ss:$0 sm:$0xff] }
  0x86   : > { %s632_s21 = scalar_lea.vmem %s3445_s1, %s631_s17  ;;  %s3446_s1 = sld [smem:[#allocation20_spill]] }
  0x87   : > { %2362 = vmatmul.mubr.msk.bf16.vlgmr.msra.gmra.mrb[0].mxu0 %vm673_vm1, %v649_v5  ;;  %v2187_v42 = vld [vmem:[%s632_s21] ss:$0 sm:$0xff]  ;;  %s2070_s17 = scalar_lea.sflag [#allocation4], %s3050_s8 }
  0x88   : > { %2344 = vmatpush3.bf16.msra.mxu1 %v2567_v2  ;;  %2373 = vmatprep.mubr.msk.bf16.mxu0 %vm2782_vm0, %v2781_v0  ;;  %v3134_v48 = vadd.f32 %v2187_v42, %v641_v43  ;;  %s3448_s22 = smov %s3447_s27 }
  0x89   : > { %2349 = vmatprep.subr.bf16.mxu1 %v2781_v0 }
  0x8b   : > { %2346 = vmatmul.mubr.msk.bf16.vlgmr.msra.gmra.mrb[0].mxu1 %vm673_vm1, %v649_v5 }
  0x8c   : > { %2350 = vmatpush3.bf16.msra.mxu1 %v2568_v4  ;;  %2353 = vmatprep.mubr.msk.bf16.mxu1 %vm2782_vm0, %v2781_v0 }
  0x8d   : > { %2351 = vmatprep.subr.bf16.mxu1 %v2781_v0 }
  0x90   : > { %2352 = vmatpush3.bf16.msra.mxu1 %v2569_v6 }
  0x91   : > { %2365 = vmatprep.subr.bf16.mxu1 %v2781_v0 }
  0x93   : > { %2354 = vmatmul.mubr.msk.bf16.vlgmr.msra.gmra.mrb[4].mxu1 %vm673_vm1, %v649_v5 }
  0x94   : > { %2367 = vmatprep.mubr.msk.bf16.mxu1 %vm2782_vm0, %v2781_v0 }
 0x15a   : > { %v837_v25 = vpop.f32.mrb[0].mxu0 }
 0x15b   : > { %v838_v26 = vadd.f32 %v2196_v24, %v837_v25  ;;  %v2363_v27 = vpop.f32.mrb[1].mxu0 }
 0x15c   : > { %v840_v28 = vpop.f32.mrb[2].mxu0 }
 0x15d   : > { %v851_v29 = vpack.c.bf16 %v838_v26, %v838_v26  ;;  %v2364_v30 = vpop.f32.mrb[3].mxu0  ;;  %v2204_v26 = vld [vmem:[%s3392_s9] ss:$0 sm:$0xff] }
 0x15e   : > { %v711_v9 = vpop.f32.mrb[0].mxu1 }
 0x15f   : > { %v2347_v10 = vpop.f32.mrb[1].mxu1  ;;  %v712_v19 = vadd.f32 %v2188_v14, %v711_v9  ;;  %v982_v31 = vsel %vm980_vm3, %v851_v29, 0  ;;  %v2573_v14 = vld [vmem:[#allocation5 + $0x8] sm:$0xff]  }
 0x160   : > { %v714_v11 = vpop.f32.mrb[2].mxu1 }
 0x161   : > { %v2348_v12 = vpop.f32.mrb[3].mxu1  ;;  %v843_v23 = vpack.c.bf16 %v712_v19, %v712_v19 }
 0x166   : > { %v774_v15 = vpop.f32.mrb[4].mxu1 }
 0x167   : > { %v775_v16 = vadd.f32 %v2192_v13, %v774_v15  ;;  %v2355_v17 = vpop.f32.mrb[5].mxu1  ;;  %v2572_v13 = vld [vmem:[#allocation5] sm:$0xff]  }
 0x168   : > { %v777_v18 = vpop.f32.mrb[6].mxu1 }
 0x169   : > { %v847_v20 = vpack.c.bf16 %v775_v16, %v775_v16  ;;  %v2356_v21 = vpop.f32.mrb[7].mxu1 }
 0x16b   : > { %v860_v22 = vsel %vm855_vm2, %v847_v20, 0  ;;  %849 = vrot.lane.b32.xlu0 %v847_v20, %s2783_s25 }
 0x16c   : > { %2366 = vmatpush3.bf16.xpose.msra.mxu1 %v860_v22 }
 0x16d   : > { %2377 = vmatprep.subr.bf16.mxu1 %v2781_v0 }
 0x16f   : > { %845 = vrot.lane.b32.xlu0 %v843_v23, %s2783_s25 }
 0x173   : > { %2368 = vmatmul.mubr.msk.bf16.vlgmr.msra.gmra.mrb[8].mxu1 %vm855_vm2, %v843_v23 }
 0x174   : > { %2379 = vmatprep.mubr.msk.bf16.mxu1 %vm2782_vm0, %v2781_v0  ;;  %2378 = vmatpush3.bf16.msra.mxu1 %v982_v31 }
 0x175   : > { %2389 = vmatprep.subr.bf16.mxu1 %v2781_v0 }
 0x1dd   : > { %v850_v32 = vpop.permute.xlu0 %849 }
 0x1de   : > { %v906_v33 = vsel %vm855_vm2, %v850_v32, 0 }
 0x1df   : > { %2372 = vmatpush3.bf16.xpose.msra.mxu0 %v906_v33 }
 0x1e0   : > { %2383 = vmatprep.subr.bf16.mxu0 %v2781_v0 }
 0x1e1   : > { %v846_v34 = vpop.permute.xlu0 %845 }
 0x1e6   : > { %2374 = vmatmul.mubr.msk.bf16.vlgmr.msra.gmra.mrb[4].mxu0 %vm855_vm2, %v846_v34 }
 0x1e7   : > { %2385 = vmatprep.mubr.msk.bf16.mxu0 %vm2782_vm0, %v2781_v0 }
 0x246   : > { %v896_v35 = vpop.f32.mrb[8].mxu1 }
 0x247   : > { %v2369_v36 = vpop.f32.mrb[9].mxu1  ;;  %v948_v45 = vmul.f32 0.25, %v896_v35 }
 0x248   : > { %v899_v37 = vpop.f32.mrb[10].mxu1 }
 0x249   : > { %v2370_v38 = vpop.f32.mrb[11].mxu1  ;;  %v950_v53 = vadd.f32 %v948_v45, %v3134_v48 }
 0x24b   : > { %v953_v54 = vsel %vm952_vm5, %v950_v53, -inf }
 0x2b9   : > { %v942_v44 = vpop.f32.mrb[4].mxu0 }
 0x2ba   : > { %v949_v46 = vmul.f32 0.25, %v942_v44  ;;  %v2375_v47 = vpop.f32.mrb[5].mxu0 }
 0x2bb   : > { %v945_v49 = vpop.f32.mrb[6].mxu0 }
 0x2bc   : > { %v2376_v50 = vpop.f32.mrb[7].mxu0  ;;  %v951_v51 = vadd.f32 %v949_v46, %v3134_v48  ;;  %v2208_v46 = vld [vmem:[%s3393_s10] ss:$0 sm:$0xff] }
 0x2bd   : > { %v2209_v49 = vld [vmem:[%s3394_s11] ss:$0 sm:$0xff] }
 0x2be   : > { %v956_v52 = vsel %vm952_vm5, %v951_v51, -inf }
 0x2bf   : > { %957 = vmax.xlane.f32.xlu1 %v956_v52 }
 0x2c3   : > { %954 = vmax.xlane.f32.xlu1 %v953_v54  ;;  %v2579_v54 = vld [vmem:[%s3397_s14 + $0x18] sm:$0xff]  }
 0x2d4   : > { %853 = vrot.lane.b32.xlu1 %v851_v29, %s2783_s25 }
 0x34c   : > { %v958_v55 = vpop.xlane.xlu1 %957 }
 0x34d   : > { %v960_v56 = vsub.f32 %v951_v51, %v958_v55  ;;  %v2210_v55 = vld [vmem:[%s3446_s1] ss:$0 sm:$0xff] }
 0x34f   : > { %v963_v57 = vmul.f32 1.442695, %v960_v56 }
 0x350   : > { %v955_v58 = vpop.xlane.xlu1 %954 }
 0x351   : > { %2594 = vpow2.f32 %v963_v57  ;;  %v959_v59 = vsub.f32 %v950_v53, %v955_v58  ;;  %v2578_v53 = vld [vmem:[%s3397_s14 + $0x10] sm:$0xff]  }
 0x353   : > { %v961_v60 = vmul.f32 1.442695, %v959_v59 }
 0x354   : > { %v854_v61 = vpop.permute.xlu1 %853 }
 0x355   : > { %2596 = vpow2.f32 %v961_v60  ;;  %v1028_v62 = vsel %vm980_vm3, %v854_v61, 0 }
 0x356   : > { %2384 = vmatpush3.bf16.msra.mxu0 %v1028_v62 }
 0x357   : > { %2397 = vmatprep.subr.bf16.mxu0 %v2781_v0 }
 0x35b   : > { %v2595_v63 = vpop.eup %2594 }
 0x35c   : > { %v968_v1 = vsel %vm952_vm5, %v2595_v63, 0.0 }
 0x35d   : > { %969 = vadd.xlane.f32.xlu0 %v968_v1 }
 0x35f   : > { %v2597_v2 = vpop.eup %2596 }
 0x360   : > { %v965_v4 = vsel %vm952_vm5, %v2597_v2, 0.0 }
 0x361   : > { %966 = vadd.xlane.f32.xlu1 %v965_v4 }
 0x3ea   : > { %v970_v5 = vpop.xlane.xlu0 %969 }
 0x3eb   : > { %2598 = vrcp.f32 %v970_v5 }
 0x3ee   : > { %v967_v6 = vpop.xlane.xlu1 %966 }
 0x3ef   : > { %2600 = vrcp.f32 %v967_v6 }
 0x3f5   : > { %v2599_v7 = vpop.eup %2598 }
 0x3f6   : > { %v974_v8 = vmul.f32 %v2599_v7, %v2595_v63  ;;  %v2214_v63 = vld [vmem:[%s3447_s27] ss:$0 sm:$0xff]  ;;  %s629_s27 = scalar_lea.vmem [#allocation8], %s3050_s8 }
 0x3f7   : > { %s2082_s18 = sshll.u32 %s629_s27, 4  ;;  %s3340_s18 = int_to_ptr.vmem [resolvable:$true] %s2082_s18 }
 0x3f8   : > { %v976_v9 = vpack.c.bf16 %v974_v8, %v974_v8  ;;  %s2704_s13 = scalar_lea.vmem %s3340_s18, 16 }
 0x3f9   : > { %v2601_v10 = vpop.eup %2600  ;;  %p2705_p0 = scmp.ne.s32.totalorder %s3340_s18, %s2704_s13 }
 0x3fa   : > { %v973_v11 = vmul.f32 %v2601_v10, %v2597_v2  ;;  %2386 = vmatmul.mubr.msk.bf16.vlgmr.msra.gmra.mrb[8].mxu0 %vm952_vm5, %v976_v9 }
 0x3fb   : > { %2401 = vmatprep.mubr.msk.bf16.mxu0 %vm2782_vm0, %v2781_v0  ;;  %2398 = vmatpush3.bf16.msra.mxu0 %v2574_v39  ;;  %p2706_p3 = pnand %p2705_p0, %p3453_p1 }
 0x3fc   : > { %v975_v12 = vpack.c.bf16 %v973_v11, %v973_v11  ;;  %2399 = vmatprep.subr.bf16.mxu0 %v2781_v0 }
 0x3fd   : > { %p2707_p7 = pneg %p2706_p3 }
 0x3fe   : > { %2380 = vmatmul.mubr.msk.bf16.vlgmr.msra.gmra.mrb[12].mxu1 %vm952_vm5, %v975_v12 }
 0x3ff   : > { %2393 = vmatprep.mubr.msk.bf16.mxu1 %vm2782_vm0, %v2781_v0  ;;  %2390 = vmatpush3.bf16.msra.mxu1 %v2572_v13 }
 0x400   : > { %2391 = vmatprep.subr.bf16.mxu1 %v2781_v0  ;;  %2400 = vmatpush3.bf16.msra.mxu0 %v2575_v40  ;;  %v2235_v40 = vld [vmem:[%s3388_s5 + $0x1] ss:$0 sm:$0xff] }
 0x401   : > { %2417 = vmatprep.subr.bf16.mxu0 %v2781_v0 }
 0x403   : > { %2392 = vmatpush3.bf16.msra.mxu1 %v2573_v14  ;;  %v2580_v14 = vld [vmem:[%s3389_s6 + $0x10] sm:$0xff]  }
 0x404   : > { %2405 = vmatprep.subr.bf16.mxu1 %v2781_v0 }
 0x4cd   : > { %v1064_v15 = vpop.f32.mrb[8].mxu0 }
 0x4ce   : > { %1071 = vrot.lane.b32.xlu0 %v1064_v15, %s3414_s15  ;;  %v2387_v16 = vpop.f32.mrb[9].mxu0  ;;  %v2581_v15 = vld [vmem:[%s3442_s2 + $0x10] sm:$0xff]   ;;  %s3450_s15 = sld [smem:[#allocation23_spill]] }
 0x4cf   : > { %v1067_v17 = vpop.f32.mrb[10].mxu0  ;;  %v2582_v16 = vld [vmem:[%s3389_s6 + $0x18] sm:$0xff]  }
 0x4d0   : > { %v2388_v18 = vpop.f32.mrb[11].mxu0  ;;  %v2583_v17 = vld [vmem:[%s3442_s2 + $0x18] sm:$0xff]  }
 0x4d1   : > { %v1018_v19 = vpop.f32.mrb[12].mxu1 }
 0x4d2   : > { %v2381_v20 = vpop.f32.mrb[13].mxu1 }
 0x4d3   : > { %v1021_v21 = vpop.f32.mrb[14].mxu1 }
 0x4d4   : > { %v2382_v22 = vpop.f32.mrb[15].mxu1 }
 0x4d5   : > { %v2220_v22 = vld [vmem:[%s3449_s19] ss:$0 sm:$0xff] }
 0x540   : > { %v1072_v23 = vpop.permute.xlu0 %1071 }
 0x541   : > { %v1074_v24 = vsel %vm855_vm2, %v1018_v19, %v1072_v23 }
 0x542   : > { %v1075_v25 = vpack.c.bf16 %v1074_v24, %v1074_v24  ;;  %v2221_v24 = vld [vmem:[%s3450_s15] ss:$0 sm:$0xff] }
 0x544   : > { %2394 = vmatmul.mubr.msk.bf16.vlgmr.msra.gmra.mrb[16].mxu1 %vm673_vm1, %v1075_v25 }
 0x545   : > { %2413 = vmatprep.mubr.msk.bf16.mxu1 %vm2782_vm0, %v2781_v0 }
 0x617   : > { %v1136_v27 = vpop.f32.mrb[16].mxu1 }
 0x618   : > { %v1137_v28 = vadd.f32 %v2204_v26, %v1136_v27  ;;  %v2395_v29 = vpop.f32.mrb[17].mxu1 }
 0x619   : > { %v1139_v30 = vpop.f32.mrb[18].mxu1  ;;  %v2584_v29 = vld [vmem:[%s3443_s4 + $0x10] sm:$0xff]  }
 0x61a   : > { %v2396_v31 = vpop.f32.mrb[19].mxu1  ;;  %v1142_v32 = vadd.f32 %v1137_v28, %v3074_v3  ;;  %v2576_v3 = vld [vmem:[%s3397_s14] sm:$0xff]  }
 0x61b   : > { %2406 = vmatpush3.bf16.msra.mxu1 %v2576_v3  ;;  %v2585_v31 = vld [vmem:[%s3443_s4 + $0x18] sm:$0xff]   ;;  %v2226_v3 = vld [vmem:[%s3444_s3 + $0x1] sm:$0x1]  ;;  %s3452_s3 = sld [smem:[#allocation24_spill]] }
 0x61c   : > { %v1145_v33 = vsel %vm673_vm1, %v1142_v32, 0.0  ;;  %2407 = vmatprep.subr.bf16.mxu1 %v2781_v0 }
 0x61d   : > { %1146 = vadd.xlane.f32.xlu0 %v1145_v33 }
 0x61f   : > { %2408 = vmatpush3.bf16.msra.mxu1 %v2577_v41 }
 0x620   : > { %2409 = vmatprep.subr.bf16.mxu1 %v2781_v0 }
 0x621   : > { %s3338_s4 = scalar_lea.hbm %s3452_s3, %s2282_s23 }
 0x623   : > { %2410 = vmatpush3.bf16.msra.mxu1 %v2578_v53 }
 0x624   : > { %2411 = vmatprep.subr.bf16.mxu1 %v2781_v0 }
 0x627   : > { %2412 = vmatpush3.bf16.msra.mxu1 %v2579_v54 }
 0x628   : > { %2433 = vmatprep.subr.bf16.mxu1 %v2781_v0 }
 0x6aa   : > { %v1147_v34 = vpop.xlane.xlu0 %1146 }
 0x6ab   : > { %v1149_v35 = vmul.f32 0.03125, %v1147_v34 }
 0x6ad   : > { %v1150_v36 = vsub.f32 %v1142_v32, %v1149_v35 }
 0x6af   : > { %v1151_v37 = vmul.f32 %v1150_v36, %v1150_v36 }
 0x6b1   : > { %v1152_v38 = vsel %vm673_vm1, %v1151_v37, 0.0 }
 0x6b2   : > { %1153 = vadd.xlane.f32.xlu1 %v1152_v38 }
 0x73f   : > { %v1154_v42 = vpop.xlane.xlu1 %1153 }
 0x740   : > { %v1155_v43 = vmul.f32 0.03125, %v1154_v42 }
 0x742   : > { %v1156_v44 = vadd.f32 1e-05, %v1155_v43 }
 0x744   : > { %2602 = vrsqrt.f32 %v1156_v44  ;;  %v2244_v44 = vld [vmem:[%s3390_s7 + $0x1] ss:$0 sm:$0xff] }
 0x74e   : > { %v2603_v45 = vpop.eup %2602 }
 0x74f   : > { %v1158_v47 = vmul.f32 %v2603_v45, %v1150_v36 }
 0x751   : > { %v1165_v50 = vmul.f32 %v2208_v46, %v1158_v47 }
 0x753   : > { %v1172_v51 = vadd.f32 %v2209_v49, %v1165_v50 }
 0x755   : > { %v1173_v52 = vpack.c.bf16 %v1172_v51, %v1172_v51 }
 0x757   : > { %2402 = vmatmul.mubr.msk.bf16.vlgmr.msra.gmra.mrb[12].mxu0 %vm673_vm1, %v1173_v52 }
 0x758   : > { %2421 = vmatprep.mubr.msk.bf16.mxu0 %vm2782_vm0, %v2781_v0  ;;  %2418 = vmatpush3.bf16.msra.mxu0 %v2581_v15 }
 0x759   : > { %2419 = vmatprep.subr.bf16.mxu0 %v2781_v0 }
 0x75c   : > { %2420 = vmatpush3.bf16.msra.mxu0 %v2583_v17 }
 0x75d   : > { %2425 = vmatprep.subr.bf16.mxu0 %v2781_v0 }
 0x82a   : > { %v1234_v56 = vpop.f32.mrb[12].mxu0 }
 0x82b   : > { %v1235_v57 = vadd.f32 %v2210_v55, %v1234_v56  ;;  %v2403_v58 = vpop.f32.mrb[13].mxu0 }
 0x82c   : > { %v1237_v59 = vpop.f32.mrb[14].mxu0  ;;  %v1661_v58 = vrot.slane %v3134_v48, 7 }
 0x82d   : > { %v1240_v60 = vmax.f32 %v1235_v57, 0.0  ;;  %v2404_v61 = vpop.f32.mrb[15].mxu0 }
 0x82f   : > { %v1241_v62 = vpack.c.bf16 %v1240_v60, %v1240_v60 }
 0x831   : > { %2414 = vmatmul.mubr.msk.bf16.vlgmr.msra.gmra.mrb[20].mxu1 %vm1281_vm6, %v1241_v62 }
 0x832   : > { %2437 = vmatprep.mubr.msk.bf16.mxu1 %vm2782_vm0, %v2781_v0  ;;  %2434 = vmatpush3.bf16.msra.mxu1 %v2580_v14 }
 0x833   : > { %2435 = vmatprep.subr.bf16.mxu1 %v2781_v0 }
 0x836   : > { %2436 = vmatpush3.bf16.msra.mxu1 %v2582_v16 }
 0x837   : > { %2447 = vmatprep.subr.bf16.mxu1 %v2781_v0 }
 0x904   : > { %v1319_v1 = vpop.f32.mrb[20].mxu1 }
 0x905   : > { %v1320_v2 = vadd.f32 %v2214_v63, %v1319_v1  ;;  %v2415_v4 = vpop.f32.mrb[21].mxu1 }
 0x906   : > { %v1322_v5 = vpop.f32.mrb[22].mxu1 }
 0x907   : > { %v2416_v6 = vpop.f32.mrb[23].mxu1  ;;  %v1325_v7 = vadd.f32 %v1320_v2, %v1172_v51 }
 0x909   : > { %v1328_v8 = vsel %vm673_vm1, %v1325_v7, 0.0 }
 0x90a   : > { %1329 = vadd.xlane.f32.xlu1 %v1328_v8 }
 0x997   : > { %v1330_v9 = vpop.xlane.xlu1 %1329 }
 0x998   : > { %v1331_v10 = vmul.f32 0.03125, %v1330_v9 }
 0x99a   : > { %v1332_v11 = vsub.f32 %v1325_v7, %v1331_v10 }
 0x99c   : > { %v1333_v12 = vmul.f32 %v1332_v11, %v1332_v11 }
 0x99e   : > { %v1334_v13 = vsel %vm673_vm1, %v1333_v12, 0.0 }
 0x99f   : > { %1335 = vadd.xlane.f32.xlu1 %v1334_v13 }
 0xa2c   : > { %v1336_v18 = vpop.xlane.xlu1 %1335 }
 0xa2d   : > { %v1337_v19 = vmul.f32 0.03125, %v1336_v18 }
 0xa2f   : > { %v1338_v20 = vadd.f32 1e-05, %v1337_v19 }
 0xa31   : > { %2604 = vrsqrt.f32 %v1338_v20 }
 0xa3b   : > { %v2605_v21 = vpop.eup %2604 }
 0xa3c   : > { %v1340_v23 = vmul.f32 %v2605_v21, %v1332_v11 }
 0xa3e   : > { %v1347_v25 = vmul.f32 %v2220_v22, %v1340_v23 }
 0xa40   : > { %v3224_v26 = vadd.f32 %v2221_v24, %v1347_v25 }
 0xa42   : > { %v1355_v27 = vpack.c.bf16 %v3224_v26, %v3224_v26 }
 0xa44   : > { %2438 = vmatmul.mubr.msk.bf16.vlgmr.msra.gmra.mrb[24].mxu1 %vm673_vm1, %v1355_v27  ;;  %v1364_v28 = vshrl.u32 %v1355_v27, 16 }
 0xa45   : > { %2449 = vmatprep.mubr.msk.bf16.mxu1 %vm2782_vm0, %v2781_v0 }
 0xa46   : > { %v1366_v30 = vrot.slane %v1364_v28, 3 }
 0xa48   : > { %2422 = vmatmul.mubr.msk.bf16.vlgmr.msra.gmra.mrb[16].mxu0 %vm673_vm1, %v1366_v30 }
 0xa49   : > { %2426 = vmatpush3.bf16.msra.mxu0 %v2584_v29  ;;  %2429 = vmatprep.mubr.msk.bf16.mxu0 %vm2782_vm0, %v2781_v0 }
 0xa4a   : > { %2427 = vmatprep.subr.bf16.mxu0 %v2781_v0 }
 0xa4d   : > { %2428 = vmatpush3.bf16.msra.mxu0 %v2585_v31  ;;  %v2586_v31 = vld [vmem:[#allocation5 + $0x10] sm:$0xff]  }
 0xa4e   : > { %2441 = vmatprep.subr.bf16.mxu0 %v2781_v0 }
 0xa50   : > { %2430 = vmatmul.mubr.msk.bf16.vlgmr.msra.gmra.mrb[20].mxu0 %vm673_vm1, %v1355_v27 }
 0xa51   : > { %2443 = vmatprep.mubr.msk.bf16.mxu0 %vm2782_vm0, %v2781_v0 }
 0xb17   : > { %v1548_v32 = vpop.f32.mrb[24].mxu1 }
 0xb18   : > { %v2439_v33 = vpop.f32.mrb[25].mxu1  ;;  %v1549_v50 = vadd.f32 %v2244_v44, %v1548_v32  ;;  %v2587_v32 = vld [vmem:[#allocation5 + $0x18] sm:$0xff]  }
 0xb19   : > { %v1551_v34 = vpop.f32.mrb[26].mxu1 }
 0xb1a   : > { %v2440_v35 = vpop.f32.mrb[27].mxu1  ;;  %v1562_v53 = vpack.c.bf16 %v1549_v50, %v1549_v50 }
 0xb1b   : > { %v1416_v36 = vpop.f32.mrb[16].mxu0 }
 0xb1c   : > { %v2423_v37 = vpop.f32.mrb[17].mxu0  ;;  %v1417_v46 = vadd.f32 %v2226_v3, %v1416_v36  ;;  %v1694_v54 = vsel %vm980_vm3, %v1562_v53, 0 }
 0xb1d   : > { %v1419_v38 = vpop.f32.mrb[18].mxu0 }
 0xb1e   : > { %v2424_v39 = vpop.f32.mrb[19].mxu0  ;;  %v1554_v52 = vpack.c.bf16 %v1417_v46, %v1417_v46 }
 0xb23   : > { %v1483_v41 = vpop.f32.mrb[20].mxu0 }
 0xb24   : > { %v1484_v42 = vadd.f32 %v2235_v40, %v1483_v41  ;;  %v2431_v43 = vpop.f32.mrb[21].mxu0 }
 0xb25   : > { %v1486_v45 = vpop.f32.mrb[22].mxu0  ;;  %v2252_v43 = vld [vmem:[%s3392_s9 + $0x1] sm:$0x1] }
 0xb26   : > { %v1558_v47 = vpack.c.bf16 %v1484_v42, %v1484_v42  ;;  %v2432_v49 = vpop.f32.mrb[23].mxu0 }
 0xb28   : > { %v1570_v51 = vsel %vm855_vm2, %v1558_v47, 0  ;;  %1560 = vrot.lane.b32.xlu1 %v1558_v47, %s2783_s25 }
 0xb29   : > { %2442 = vmatpush3.bf16.xpose.msra.mxu0 %v1570_v51 }
 0xb2a   : > { %2453 = vmatprep.subr.bf16.mxu0 %v2781_v0 }
 0xb2c   : > { %1556 = vrot.lane.b32.xlu1 %v1554_v52, %s2783_s25 }
 0xb30   : > { %2444 = vmatmul.mubr.msk.bf16.vlgmr.msra.gmra.mrb[24].mxu0 %vm855_vm2, %v1554_v52 }
 0xb31   : > { %2454 = vmatpush3.bf16.msra.mxu0 %v1694_v54  ;;  %2455 = vmatprep.mubr.msk.bf16.mxu0 %vm2782_vm0, %v2781_v0 }
 0xb32   : > { %2465 = vmatprep.subr.bf16.mxu0 %v2781_v0 }
 0xb9a   : > { %v1561_v55 = vpop.permute.xlu1 %1560 }
 0xb9b   : > { %v1616_v56 = vsel %vm855_vm2, %v1561_v55, 0 }
 0xb9c   : > { %2448 = vmatpush3.bf16.xpose.msra.mxu1 %v1616_v56 }
 0xb9d   : > { %2459 = vmatprep.subr.bf16.mxu1 %v2781_v0 }
 0xb9e   : > { %v1557_v57 = vpop.permute.xlu1 %1556 }
 0xba3   : > { %2450 = vmatmul.mubr.msk.bf16.vlgmr.msra.gmra.mrb[28].mxu1 %vm855_vm2, %v1557_v57 }
 0xba4   : > { %2461 = vmatprep.mubr.msk.bf16.mxu1 %vm2782_vm0, %v2781_v0 }
 0xc03   : > { %v1606_v59 = vpop.f32.mrb[24].mxu0 }
 0xc04   : > { %v1658_v60 = vmul.f32 0.25, %v1606_v59  ;;  %v2445_v61 = vpop.f32.mrb[25].mxu0  ;;  %v2589_v59 = vld [vmem:[#allocation7 + $0x18] sm:$0xff]  }
 0xc05   : > { %v1609_v62 = vpop.f32.mrb[26].mxu0 }
 0xc06   : > { %v2446_v63 = vpop.f32.mrb[27].mxu0  ;;  %v1663_v1 = vadd.f32 %v1661_v58, %v1658_v60  ;;  %v2591_v60 = vld [vmem:[%s3397_s14 + $0x28] sm:$0xff]  }
 0xc08   : > { %v1666_v2 = vsel %vm1665_vm7, %v1663_v1, -inf }
 0xc09   : > { %1667 = vmax.xlane.f32.xlu1 %v1666_v2  ;;  %v2258_v2 = vld [vmem:[%s3393_s10 + $0x1] ss:$0 sm:$0xff] }
 0xc76   : > { %v1652_v4 = vpop.f32.mrb[28].mxu1 }
 0xc77   : > { %v1659_v5 = vmul.f32 0.25, %v1652_v4  ;;  %v2451_v6 = vpop.f32.mrb[29].mxu1 }
 0xc78   : > { %v1655_v7 = vpop.f32.mrb[30].mxu1 }
 0xc79   : > { %v2452_v8 = vpop.f32.mrb[31].mxu1  ;;  %v1664_v9 = vadd.f32 %v1661_v58, %v1659_v5  ;;  %v2588_v58 = vld [vmem:[#allocation7 + $0x10] sm:$0xff]  }
 0xc7a   : > { %v2259_v5 = vld [vmem:[%s3394_s11 + $0x1] ss:$0 sm:$0xff] }
 0xc7b   : > { %v1669_v10 = vsel %vm1665_vm7, %v1664_v9, -inf }
 0xc7c   : > { %1670 = vmax.xlane.f32.xlu0 %v1669_v10 }
 0xc96   : > { %v1668_v15 = vpop.xlane.xlu1 %1667 }
 0xc97   : > { %v1672_v16 = vsub.f32 %v1663_v1, %v1668_v15 }
 0xc99   : > { %v1674_v17 = vmul.f32 1.442695, %v1672_v16 }
 0xd09   : > { %v1671_v48 = vpop.xlane.xlu0 %1670 }
 0xd0a   : > { %v1673_v11 = vsub.f32 %v1664_v9, %v1671_v48  ;;  %v2592_v48 = vld [vmem:[%s3397_s14 + $0x30] sm:$0xff]  }
 0xd0c   : > { %v1676_v12 = vmul.f32 1.442695, %v1673_v11  ;;  %v2593_v11 = vld [vmem:[%s3397_s14 + $0x38] sm:$0xff]  }
 0xd0e   : > { %2606 = vpow2.f32 %v1676_v12  ;;  %v2260_v12 = vld [vmem:[%s3446_s1 + $0x1] sm:$0x1] }
 0xd0f   : > { %2608 = vpow2.f32 %v1674_v17 }
 0xd18   : > { %v2607_v13 = vpop.eup %2606 }
 0xd19   : > { %v1681_v14 = vsel %vm1665_vm7, %v2607_v13, 0.0  ;;  %v2609_v18 = vpop.eup %2608 }
 0xd1a   : > { %1682 = vadd.xlane.f32.xlu0 %v1681_v14  ;;  %v1678_v19 = vsel %vm1665_vm7, %v2609_v18, 0.0 }
 0xd30   : > { %1564 = vrot.lane.b32.xlu0 %v1562_v53, %s2783_s25  ;;  %s3451_s25 = smov 16  }
 0xd4f   : > { %1679 = vadd.xlane.f32.xlu0 %v1678_v19 }
 0xda7   : > { %v1683_v20 = vpop.xlane.xlu0 %1682 }
 0xda8   : > { %2610 = vrcp.f32 %v1683_v20 }
 0xdab   : > { %v1565_v21 = vpop.permute.xlu0 %1564 }
 0xdac   : > { %v1740_v22 = vsel %vm980_vm3, %v1565_v21, 0 }
 0xdad   : > { %2460 = vmatpush3.bf16.msra.mxu1 %v1740_v22 }
 0xdae   : > { %2473 = vmatprep.subr.bf16.mxu1 %v2781_v0 }
 0xdb2   : > { %v2611_v23 = vpop.eup %2610 }
 0xdb3   : > { %v1687_v24 = vmul.f32 %v2611_v23, %v2607_v13 }
 0xdb5   : > { %v1689_v25 = vpack.c.bf16 %v1687_v24, %v1687_v24 }
 0xdb7   : > { %2462 = vmatmul.mubr.msk.bf16.vlgmr.msra.gmra.mrb[32].mxu1 %vm952_vm5, %v1689_v25 }
 0xdb8   : > { %2477 = vmatprep.mubr.msk.bf16.mxu1 %vm2782_vm0, %v2781_v0  ;;  %2474 = vmatpush3.bf16.msra.mxu1 %v2588_v58 }
 0xdb9   : > { %2475 = vmatprep.subr.bf16.mxu1 %v2781_v0 }
 0xdbc   : > { %2476 = vmatpush3.bf16.msra.mxu1 %v2589_v59 }
 0xddc   : > { %v1680_v27 = vpop.xlane.xlu0 %1679 }
 0xddd   : > { %2612 = vrcp.f32 %v1680_v27 }
 0xde7   : > { %v2613_v28 = vpop.eup %2612 }
 0xde8   : > { %v1686_v29 = vmul.f32 %v2613_v28, %v2609_v18 }
 0xdea   : > { %v1688_v30 = vpack.c.bf16 %v1686_v29, %v1686_v29 }
 0xdec   : > { %2456 = vmatmul.mubr.msk.bf16.vlgmr.msra.gmra.mrb[28].mxu0 %vm952_vm5, %v1688_v30 }
 0xded   : > { %2469 = vmatprep.mubr.msk.bf16.mxu0 %vm2782_vm0, %v2781_v0  ;;  %2466 = vmatpush3.bf16.msra.mxu0 %v2586_v31 }
 0xdee   : > { %2467 = vmatprep.subr.bf16.mxu0 %v2781_v0 }
 0xdf1   : > { %2468 = vmatpush3.bf16.msra.mxu0 %v2587_v32 }
 0xdf2   : > { %2481 = vmatprep.subr.bf16.mxu0 %v2781_v0 }
 0xe8a   : > { %v1776_v33 = vpop.f32.mrb[32].mxu1 }
 0xe8b   : > { %1783 = vrot.lane.b32.xlu1 %v1776_v33, %s3451_s25  ;;  %v2463_v34 = vpop.f32.mrb[33].mxu1  ;;  %s2708_s25 = sshll.u32 %s2785_s0, 4  ;;  %s2709_s25 = int_to_ptr.vmem [resolvable:$false] %s2708_s25 }
 0xe8c   : > { %v1779_v35 = vpop.f32.mrb[34].mxu1  ;;  %s2710_s21 = scalar_lea.vmem %s2709_s25, 32  ;;  %p2711_p9 = scmp.lt.s32.totalorder %s3340_s18, %s2709_s25 }
 0xe8d   : > { %v2464_v36 = vpop.f32.mrb[35].mxu1  ;;  %p2712_p12 = scmp.lt.s32.totalorder %s2710_s21, %s2704_s13 }
 0xe8f   : > { %p2713_p2 = por %p2712_p12, %p2711_p9 }
 0xe91   : > { %p2714_p13 = pnand %p2713_p2, %p2707_p7 }
 0xebf   : > { %v1730_v37 = vpop.f32.mrb[28].mxu0 }
 0xec0   : > { %v2457_v38 = vpop.f32.mrb[29].mxu0 }
 0xec1   : > { %v1733_v39 = vpop.f32.mrb[30].mxu0  ;;  %v2280_v38 = vld [vmem:[%s3449_s19 + $0x1] ss:$0 sm:$0xff] }
 0xec2   : > { %v2458_v40 = vpop.f32.mrb[31].mxu0 }
 0xec3   : > { %v2281_v40 = vld [vmem:[%s3450_s15 + $0x1] ss:$0 sm:$0xff] }
 0xefd   : > { %v1784_v3 = vpop.permute.xlu1 %1783 }
 0xefe   : > { %v1786_v41 = vsel %vm855_vm2, %v1730_v37, %v1784_v3 }
 0xeff   : > { %v1787_v42 = vpack.c.bf16 %v1786_v41, %v1786_v41 }
 0xf01   : > { %2470 = vmatmul.mubr.msk.bf16.vlgmr.msra.gmra.mrb[32].mxu0 %vm673_vm1, %v1787_v42 }
 0xf02   : > { %2489 = vmatprep.mubr.msk.bf16.mxu0 %vm2782_vm0, %v2781_v0 }
 0xfd4   : > { %v1844_v44 = vpop.f32.mrb[32].mxu0 }
 0xfd5   : > { %v1845_v45 = vadd.f32 %v2252_v43, %v1844_v44  ;;  %v2471_v46 = vpop.f32.mrb[33].mxu0 }
 0xfd6   : > { %v1847_v47 = vpop.f32.mrb[34].mxu0 }
 0xfd7   : > { %v1851_v49 = vrot.slane %v1845_v45, 1  ;;  %v2472_v50 = vpop.f32.mrb[35].mxu0 }
 0xfd9   : > { %v1853_v51 = vadd.f32 %v1851_v49, %v3224_v26  ;;  %v2590_v26 = vld [vmem:[%s3397_s14 + $0x20] sm:$0xff]  }
 0xfda   : > { %2482 = vmatpush3.bf16.msra.mxu0 %v2590_v26 }
 0xfdb   : > { %v1859_v52 = vsel %vm1858_vm8, %v1853_v51, 0.0  ;;  %2483 = vmatprep.subr.bf16.mxu0 %v2781_v0 }
 0xfdc   : > { %1860 = vadd.xlane.f32.xlu1 %v1859_v52 }
 0xfde   : > { %2484 = vmatpush3.bf16.msra.mxu0 %v2591_v60 }
 0xfdf   : > { %2485 = vmatprep.subr.bf16.mxu0 %v2781_v0 }
 0xfe2   : > { %2486 = vmatpush3.bf16.msra.mxu0 %v2592_v48 }
 0xfe3   : > { %2487 = vmatprep.subr.bf16.mxu0 %v2781_v0  ;;  %v2272_v0 = vld [vmem:[%s3448_s22 + $0x1] sm:$0x1] }
 0xfe6   : > { %2488 = vmatpush3.bf16.msra.mxu0 %v2593_v11 }
0x1069   : > { %v1861_v53 = vpop.xlane.xlu1 %1860 }
0x106a   : > { %v1862_v54 = vmul.f32 0.03125, %v1861_v53 }
0x106c   : > { %v1863_v55 = vsub.f32 %v1853_v51, %v1862_v54 }
0x106e   : > { %v1864_v56 = vmul.f32 %v1863_v55, %v1863_v55 }
0x1070   : > { %v1865_v57 = vsel %vm1858_vm8, %v1864_v56, 0.0 }
0x1071   : > { %1866 = vadd.xlane.f32.xlu0 %v1865_v57 }
0x10fe   : > { %v1867_v61 = vpop.xlane.xlu0 %1866 }
0x10ff   : > { %v1868_v62 = vmul.f32 0.03125, %v1867_v61 }
0x1101   : > { %v1869_v63 = vadd.f32 1e-05, %v1868_v62 }
0x1103   : > { %2614 = vrsqrt.f32 %v1869_v63 }
0x110d   : > { %v2615_v1 = vpop.eup %2614 }
0x110e   : > { %v1871_v4 = vmul.f32 %v2615_v1, %v1863_v55 }
0x1110   : > { %v1878_v6 = vmul.f32 %v2258_v2, %v1871_v4 }
0x1112   : > { %v1885_v7 = vadd.f32 %v2259_v5, %v1878_v6 }
0x1114   : > { %v1886_v8 = vpack.c.bf16 %v1885_v7, %v1885_v7 }
0x1116   : > { %v1895_v9 = vshrl.u32 %v1886_v8, 16 }
0x1118   : > { %v1897_v10 = vrot.slane %v1895_v9, 3 }
0x111a   : > { %2478 = vmatmul.mubr.msk.bf16.vlgmr.msra.gmra.mrb[36].mxu1 %vm673_vm1, %v1897_v10 }
0x11ed   : > { %v1947_v13 = vpop.f32.mrb[36].mxu1 }
0x11ee   : > { %v1948_v14 = vadd.f32 %v2260_v12, %v1947_v13  ;;  %v2479_v15 = vpop.f32.mrb[37].mxu1 }
0x11ef   : > { %v1950_v16 = vpop.f32.mrb[38].mxu1 }
0x11f0   : > { %v1953_v17 = vmax.f32 %v1948_v14, 0.0  ;;  %v2480_v18 = vpop.f32.mrb[39].mxu1 }
0x11f2   : > { %v1954_v19 = vpack.c.bf16 %v1953_v17, %v1953_v17 }
0x11f4   : > { %2490 = vmatmul.mubr.msk.bf16.vlgmr.msra.gmra.mrb[36].mxu0 %vm1281_vm6, %v1954_v19 }
0x12c7   : > { %v2027_v20 = vpop.f32.mrb[36].mxu0 }
0x12c8   : > { %v2028_v21 = vadd.f32 %v2272_v0, %v2027_v20  ;;  %v2491_v22 = vpop.f32.mrb[37].mxu0 }
0x12c9   : > { %v2030_v23 = vpop.f32.mrb[38].mxu0 }
0x12ca   : > { %v2034_v24 = vrot.slane %v2028_v21, 1  ;;  %v2492_v25 = vpop.f32.mrb[39].mxu0 }
0x12cc   : > { %v2036_v27 = vadd.f32 %v2034_v24, %v1885_v7 }
0x12ce   : > { %v2041_v28 = vsel %vm1858_vm8, %v2036_v27, 0.0 }
0x12cf   : > { %2042 = vadd.xlane.f32.xlu0 %v2041_v28 }
0x135c   : > { %v2043_v29 = vpop.xlane.xlu0 %2042 }
0x135d   : > { %v2044_v30 = vmul.f32 0.03125, %v2043_v29 }
0x135f   : > { %v2045_v31 = vsub.f32 %v2036_v27, %v2044_v30 }
0x1361   : > { %v2046_v32 = vmul.f32 %v2045_v31, %v2045_v31 }
0x1363   : > { %v2047_v33 = vsel %vm1858_vm8, %v2046_v32, 0.0 }
0x1364   : > { %2048 = vadd.xlane.f32.xlu0 %v2047_v33 }
0x13f1   : > { %v2049_v34 = vpop.xlane.xlu0 %2048 }
0x13f2   : > { %v2050_v35 = vmul.f32 0.03125, %v2049_v34 }
0x13f4   : > { %v2051_v36 = vadd.f32 1e-05, %v2050_v35 }
0x13f6   : > { %2616 = vrsqrt.f32 %v2051_v36 }
0x1400   : > { %v2617_v37 = vpop.eup %2616 }
0x1401   : > { %v2053_v39 = vmul.f32 %v2617_v37, %v2045_v31 }
0x1403   : > { %v2060_v3 = vmul.f32 %v2280_v38, %v2053_v39 }
0x1405   : > { %v2067_v41 = vadd.f32 %v2281_v40, %v2060_v3 }
0x1407   : > { %2068 = vst.msk [vmem:[%s629_s27 - $0x7] sm:$0x80] %vm1858_vm8, %v2067_v41 }
0x1408   : > { %2717 = shalt.err (!%p2714_p13)
}
0x1409   : > { %s2718_s8 = scalar_lea.hbm %s3338_s4, 16  ;;  %s2722_s23 = scalar_lea.hbm %s3452_s3, 32 }
0x140a   : > { %p2719_p6 = scmp.ne.s32.totalorder %s3338_s4, %s2718_s8  ;;  %p2723_p5 = scmp.lt.u32.totalorder %s3338_s4, %s3452_s3 }
0x140b   : > { %p2724_p11 = scmp.lt.u32.totalorder %s2722_s23, %s2718_s8  ;;  %p2726_p0 = scmp.lt.u32.totalorder %s2718_s8, %s3338_s4 }
0x140c   : > { %p2720_p10 = pnand %p2719_p6, %p3453_p1 }
0x140d   : > { %p2725_p8 = por %p2724_p11, %p2723_p5 }
0x140e   : > { %p2721_p4 = pneg %p2720_p10 }
0x140f   : > { %p2727_p3 = por %p2726_p0, %p2725_p8 }
0x1411   : > { %p2728_p7 = pnand %p2727_p3, %p2721_p4 }
0x1413   : > { %2731 = shalt.err (!%p2728_p7)
}
0x1414   : > { %2503 = dma.vmem_to_hbm [thread:$0]  (%p3453_p1), %s3340_s18, 16, %s3338_s4, %s2070_s17  }
0x1415 PF: > { %s3454_s13 = sld [smem:[#allocation12_spill]]  ;;  %s3455_s25 = sld [smem:[#allocation13_spill]] }
0x1416   : > { %p3457_p12 = scmp.ge.s32.totalorder %s2774_s30, 2 }
0x141b   : > { %s2094_s21 = sand.u32 1, %s3454_s13   ;;  %p3456_p9 = scmp.ne.s32.totalorder %s3455_s25, 0 }
0x141c   : > { %s2095_s2 = scalar_lea.sflag [#allocation4], %s2094_s21 }
0x141d   : > { %p2517_p2 = pnand %p3457_p12, %p3456_p9 }
0x141f   : > { %2757 = dma.done.wait (!%p2517_p2), %s2095_s2, 16  }
0x1420   : > { %2759 = vsyncadd (!%p2517_p2), %s2095_s2, 4294967280  ;;  %p32_p13 = scmp.ge.s32.totalorder %s2991_s16, 4   ;;  %s3458_s27 = smov %s2766_s28 }
0x1421   : > { %s3459_s28 = smov %s2770_s29  ;;  %s3460_s29 = smov %s3007_s26 }
0x1422   : > { %s3461_s30 = smov %s2991_s16  ;;  %34 = sbr.rel (!%p32_p13) target bundleno = 18 (0x12), region = 164 }
0x1429   :  { %2099 = vsyncpa [#allocation3], 1 }
0x142a   :  { %2101 = vsyncpa [#allocation3 + $0x1], 1 }
0x142b   :  { %2102 = vsyncpa [#allocation6], 1 }
0x142c   :  { %2103 = vsyncpa [#allocation4], 1 }
0x142d   :  { %2105 = vsyncpa [#allocation4 + $0x1], 1 }

</bundles_post_ra>
